<compile_context>
chip_gen: v6e
topology: v6e:2x2x1
jax: 0.10.0
libtpu: 0.0.40
codegen_flags: <defaults>
</compile_context>

<pallas_src>
import numpy as np
import jax
import jax.numpy as jnp
from jax.experimental import pallas as pl
from jax.experimental.pallas import tpu as pltpu

NEG_SLOPE = 0.33
NUM_CLASSES = 2

# Static geometry implied by the module (fc1 expects 16*6*6 = 576 features).
C1, C2 = 8, 16          # conv output channels
H0 = W0 = 30            # single-channel input spatial size
H1 = W1 = 28            # conv1 "valid" output
HP1 = WP1 = 14          # after 2x2 max-pool
H2 = W2 = 12            # conv2 "valid" output
HP2 = WP2 = 6           # after 2x2 max-pool
FC_HID = 64


def _leaky(v):
    return jnp.where(v > 0, v, NEG_SLOPE * v)


# ------------------------------ fused kernel --------------------------------

def _fused_cnn_kernel(x_ref, b1m_ref, b1b_ref, pw_ref, ph_ref,
                      b2m_ref, b2b_ref, qw_ref, qh_ref,
                      fc1_ref, fc1b_ref, fc2_ref, fc2b_ref,
                      out_ref, a1_scr, a2_scr):
    f32 = jnp.float32

    # ---- conv1 (1->8, 3x3, valid) as 3 banded matmuls -> (28, 8*28) --------
    y1 = b1b_ref[...]                             # (1, 224), lanes = c*28 + w
    for dy in range(3):                           # static, unrolled
        xd = x_ref[0, dy:dy + H1, :]              # (28, 30) window load
        y1 = y1 + jnp.dot(xd, b1m_ref[dy], preferred_element_type=f32)
    y1 = _leaky(y1)                               # (28, 224)

    # ---- fused 2x2 max-pool (parity-selection matmuls) -> (14, 8*14) -------
    cmax = jnp.maximum(jnp.dot(y1, pw_ref[0], preferred_element_type=f32),
                       jnp.dot(y1, pw_ref[1], preferred_element_type=f32))
    a1_scr[...] = jnp.maximum(
        jnp.dot(ph_ref[0], cmax, preferred_element_type=f32),
        jnp.dot(ph_ref[1], cmax, preferred_element_type=f32))
    # a1_scr: (14, 112), lanes = c*14 + w

    # ---- conv2 (8->16, 3x3, valid) as 3 banded matmuls -> (12, 16*12) ------
    y2 = b2b_ref[...]                             # (1, 192), lanes = o*12 + w
    for dy in range(3):
        ad = a1_scr[dy:dy + H2, :]                # (12, 112) sublane-offset load
        y2 = y2 + jnp.dot(ad, b2m_ref[dy], preferred_element_type=f32)
    y2 = _leaky(y2)                               # (12, 192)

    # ---- fused 2x2 max-pool -> (6, 16*6) ------------------------------------
    cmax2 = jnp.maximum(jnp.dot(y2, qw_ref[0], preferred_element_type=f32),
                        jnp.dot(y2, qw_ref[1], preferred_element_type=f32))
    a2_scr[...] = jnp.maximum(
        jnp.dot(qh_ref[0], cmax2, preferred_element_type=f32),
        jnp.dot(qh_ref[1], cmax2, preferred_element_type=f32))
    # a2_scr: (6, 96), lanes = o*6 + w

    # ---- fc1 (576->64); NCHW flatten folded into pre-permuted blocks -------
    h = fc1b_ref[...]                             # (1, 64)
    for i in range(HP2):
        h = h + jnp.dot(a2_scr[i:i + 1, :], fc1_ref[i],
                        preferred_element_type=f32)
    h = _leaky(h)

    # ---- fc2 (64->2) + log_softmax ------------------------------------------
    z = jnp.dot(h, fc2_ref[...], preferred_element_type=f32) + fc2b_ref[...]
    m = jnp.max(z, axis=-1, keepdims=True)
    e = z - m
    lse = jnp.log(jnp.sum(jnp.exp(e), axis=-1, keepdims=True))
    out_ref[0] = (e - lse).astype(out_ref.dtype)  # (1, 2) row of this sample


def cnn_forward(x_nchw, kp):
    n, c, h, w = x_nchw.shape
    assert c == 1 and h == H0 and w == W0, "CNN expects [N, 1, 30, 30] inputs"
    x = x_nchw.reshape(n, H0, W0).astype(jnp.float32)

    vmem = pl.BlockSpec(memory_space=pltpu.MemorySpace.VMEM)  # whole-array resident
    out = pl.pallas_call(
        _fused_cnn_kernel,
        out_shape=jax.ShapeDtypeStruct((n, 1, NUM_CLASSES), jnp.float32),
        grid=(n,),
        in_specs=[pl.BlockSpec((1, H0, W0), lambda i: (i, 0, 0))] + [vmem] * 12,
        out_specs=pl.BlockSpec((1, 1, NUM_CLASSES), lambda i: (i, 0, 0)),
        scratch_shapes=[pltpu.VMEM((HP1, C1 * WP1), jnp.float32),
                        pltpu.VMEM((HP2, C2 * WP2), jnp.float32)],
        compiler_params=pltpu.CompilerParams(
            dimension_semantics=("parallel",),          # megacore batch sharding
            vmem_limit_bytes=32 * 1024 * 1024),
    )(x, kp["conv1_band"], kp["conv1_bias"], kp["pool1_w"], kp["pool1_h"],
      kp["conv2_band"], kp["conv2_bias"], kp["pool2_w"], kp["pool2_h"],
      kp["fc1_blocks"], kp["fc1_bias"], kp["fc2_w"], kp["fc2_bias"])
    return out.reshape(n, NUM_CLASSES)


# -------------------- one-time parameter re-layout (host) -------------------

def _parity_cols(groups, width):
    # s[r][g*width + 2q + r, g*(width//2) + q] = 1  (even/odd lane selection)
    half = width // 2
    s = np.zeros((2, groups * width, groups * half), np.float32)
    for r in range(2):
        for g in range(groups):
            for q in range(half):
                s[r, g * width + 2 * q + r, g * half + q] = 1.0
    return jnp.asarray(s)


def _parity_rows(rows_out):
    # p[r][i, 2i + r] = 1  (even/odd row selection)
    p = np.zeros((2, rows_out, 2 * rows_out), np.float32)
    for r in range(2):
        for i in range(rows_out):
            p[r, i, 2 * i + r] = 1.0
    return jnp.asarray(p)


def _conv1_band(w1):
    # band[dy, j + dx, c*28 + j] = w1[c, 0, dy, dx]
    jj = np.arange(W1)
    cc = np.arange(C1)
    rows = np.broadcast_to(jj[None, :], (C1, W1))
    cols = np.broadcast_to(cc[:, None] * W1 + jj[None, :], (C1, W1))
    band = jnp.zeros((3, W0, C1 * W1), jnp.float32)
    for dy in range(3):
        for dx in range(3):
            vals = jnp.broadcast_to(w1[:, 0, dy, dx][:, None], (C1, W1))
            band = band.at[dy, rows + dx, cols].set(vals)
    return band


def _conv2_band(w2):
    # band[dy, c*14 + j + dx, o*12 + j] = w2[o, c, dy, dx]
    jj = np.arange(W2)
    cc = np.arange(C1)
    oo = np.arange(C2)
    rows = np.broadcast_to(cc[:, None, None] * WP1 + jj[None, None, :], (C1, C2, W2))
    cols = np.broadcast_to(oo[None, :, None] * W2 + jj[None, None, :], (C1, C2, W2))
    band = jnp.zeros((3, C1 * WP1, C2 * W2), jnp.float32)
    for dy in range(3):
        for dx in range(3):
            vals = jnp.broadcast_to(jnp.transpose(w2[:, :, dy, dx])[:, :, None],
                                    (C1, C2, W2))
            band = band.at[dy, rows + dx, cols].set(vals)
    return band


def _fc1_blocks(w_fc1):
    # block[i, o*6 + q, k] = w_fc1[k, o*36 + i*6 + q]  (folds the NCHW flatten)
    oo = np.arange(C2)
    qq = np.arange(WP2)
    blocks = []
    for i in range(HP2):
        f_idx = (oo[:, None] * (HP2 * WP2) + i * WP2 + qq[None, :]).reshape(-1)
        blocks.append(jnp.transpose(w_fc1[:, f_idx]))            # (96, 64)
    return jnp.stack(blocks, axis=0).astype(jnp.float32)


def prepare_kernel_params(p):
    """One-time re-layout of PyTorch-style parameters into kernel operands."""
    return dict(
        conv1_band=_conv1_band(p["w_conv1"].astype(jnp.float32)),      # (3, 30, 224)
        conv1_bias=jnp.repeat(p["b_conv1"].astype(jnp.float32), W1)[None, :],
        pool1_w=_parity_cols(C1, W1),                                  # (2, 224, 112)
        pool1_h=_parity_rows(HP1),                                     # (2, 14, 28)
        conv2_band=_conv2_band(p["w_conv2"].astype(jnp.float32)),      # (3, 112, 192)
        conv2_bias=jnp.repeat(p["b_conv2"].astype(jnp.float32), W2)[None, :],
        pool2_w=_parity_cols(C2, W2),                                  # (2, 192, 96)
        pool2_h=_parity_rows(HP2),                                     # (2, 6, 12)
        fc1_blocks=_fc1_blocks(p["w_fc1"].astype(jnp.float32)),        # (6, 96, 64)
        fc1_bias=p["b_fc1"].astype(jnp.float32)[None, :],              # (1, 64)
        fc2_w=jnp.transpose(p["w_fc2"]).astype(jnp.float32),           # (64, 2)
        fc2_bias=p["b_fc2"].astype(jnp.float32)[None, :],              # (1, 2)
    )


def init_params(key):
    ks = jax.random.split(key, 8)

    def u(k, shape, fan_in):
        bound = 1.0 / jnp.sqrt(jnp.float32(fan_in))
        return jax.random.uniform(k, shape, jnp.float32, -bound, bound)

    # Weight shapes follow the PyTorch module (torch layouts).
    return dict(
        w_conv1=u(ks[0], (C1, 1, 3, 3), 1 * 9),
        b_conv1=u(ks[1], (C1,), 1 * 9),
        w_conv2=u(ks[2], (C2, C1, 3, 3), C1 * 9),
        b_conv2=u(ks[3], (C2,), C1 * 9),
        w_fc1=u(ks[4], (FC_HID, C2 * HP2 * WP2), C2 * HP2 * WP2),
        b_fc1=u(ks[5], (FC_HID,), C2 * HP2 * WP2),
        w_fc2=u(ks[6], (NUM_CLASSES, FC_HID), FC_HID),
        b_fc2=u(ks[7], (NUM_CLASSES,), FC_HID),
    )


# ------------------------ pure-JAX reference (check) ------------------------

def _reference_forward(x_nchw, p):
    hi = jax.lax.Precision.HIGHEST

    def pool(y):
        return jnp.maximum(jnp.maximum(y[:, :, 0::2, 0::2], y[:, :, 0::2, 1::2]),
                           jnp.maximum(y[:, :, 1::2, 0::2], y[:, :, 1::2, 1::2]))

    x = x_nchw.astype(jnp.float32)
    y = jax.lax.conv_general_dilated(
        x, p["w_conv1"], window_strides=(1, 1), padding="VALID",
        dimension_numbers=("NCHW", "OIHW", "NCHW"), precision=hi)
    y = pool(_leaky(y + p["b_conv1"][None, :, None, None]))
    y = jax.lax.conv_general_dilated(
        y, p["w_conv2"], window_strides=(1, 1), padding="VALID",
        dimension_numbers=("NCHW", "OIHW", "NCHW"), precision=hi)
    y = pool(_leaky(y + p["b_conv2"][None, :, None, None]))
    flat = y.reshape(y.shape[0], -1)                       # torch.flatten (NCHW)
    h = _leaky(jnp.dot(flat, p["w_fc1"].T, precision=hi) + p["b_fc1"])
    z = jnp.dot(h, p["w_fc2"].T, precision=hi) + p["b_fc2"]
    return jax.nn.log_softmax(z, axis=-1)


if __name__ == "__main__":
    key = jax.random.PRNGKey(0)
    k_x, k_p = jax.random.split(key)
    # 576 = 16 * 6 * 6 implies 30x30 single-channel inputs.
    x = jax.random.normal(k_x, (2, 1, 30, 30), dtype=jnp.float32)
    params = init_params(k_p)
    kparams = prepare_kernel_params(params)       # one-time weight re-layout

    out = jax.jit(cnn_forward)(x, kparams)
    jax.block_until_ready(out)
    assert out.shape == (2, NUM_CLASSES)

    ref = _reference_forward(x, params)
    assert float(jnp.max(jnp.abs(out - ref))) < 1e-3, "mismatch vs reference"

    print("KERNEL_OK")
</pallas_src>

<mosaic_0001>
module attributes {stable_mosaic.version = 11 : i64} {
  func.func @_fused_cnn_kernel(%arg0: i32, %arg1: memref<1x30x30xf32, #tpu.memory_space<vmem>>, %arg2: memref<3x30x224xf32, #tpu.memory_space<vmem>>, %arg3: memref<1x224xf32, #tpu.memory_space<vmem>>, %arg4: memref<2x224x112xf32, #tpu.memory_space<vmem>>, %arg5: memref<2x14x28xf32, #tpu.memory_space<vmem>>, %arg6: memref<3x112x192xf32, #tpu.memory_space<vmem>>, %arg7: memref<1x192xf32, #tpu.memory_space<vmem>>, %arg8: memref<2x192x96xf32, #tpu.memory_space<vmem>>, %arg9: memref<2x6x12xf32, #tpu.memory_space<vmem>>, %arg10: memref<6x96x64xf32, #tpu.memory_space<vmem>>, %arg11: memref<1x64xf32, #tpu.memory_space<vmem>>, %arg12: memref<64x2xf32, #tpu.memory_space<vmem>>, %arg13: memref<1x2xf32, #tpu.memory_space<vmem>>, %arg14: memref<1x1x2xf32, #tpu.memory_space<vmem>>, %arg15: memref<14x112xf32, #tpu.memory_space<vmem>>, %arg16: memref<6x96xf32, #tpu.memory_space<vmem>>) attributes {dimension_semantics = [#tpu.dimension_semantics<parallel>], iteration_bounds = array<i64: 2>, scalar_prefetch = 0 : i64, scratch_operands = 2 : i64, tpu.core_type = #tpu.core_type<tc>, window_params = [{transform_indices = @transform_0, window_bounds = array<i64: 1, 30, 30>}, {pipeline_mode = #tpu.pipeline_mode<synchronous>, transform_indices = @transform_1, window_bounds = array<i64: 3, 30, 224>}, {pipeline_mode = #tpu.pipeline_mode<synchronous>, transform_indices = @transform_2, window_bounds = array<i64: 1, 224>}, {pipeline_mode = #tpu.pipeline_mode<synchronous>, transform_indices = @transform_3, window_bounds = array<i64: 2, 224, 112>}, {pipeline_mode = #tpu.pipeline_mode<synchronous>, transform_indices = @transform_4, window_bounds = array<i64: 2, 14, 28>}, {pipeline_mode = #tpu.pipeline_mode<synchronous>, transform_indices = @transform_5, window_bounds = array<i64: 3, 112, 192>}, {pipeline_mode = #tpu.pipeline_mode<synchronous>, transform_indices = @transform_6, window_bounds = array<i64: 1, 192>}, {pipeline_mode = #tpu.pipeline_mode<synchronous>, transform_indices = @transform_7, window_bounds = array<i64: 2, 192, 96>}, {pipeline_mode = #tpu.pipeline_mode<synchronous>, transform_indices = @transform_8, window_bounds = array<i64: 2, 6, 12>}, {pipeline_mode = #tpu.pipeline_mode<synchronous>, transform_indices = @transform_9, window_bounds = array<i64: 6, 96, 64>}, {pipeline_mode = #tpu.pipeline_mode<synchronous>, transform_indices = @transform_10, window_bounds = array<i64: 1, 64>}, {pipeline_mode = #tpu.pipeline_mode<synchronous>, transform_indices = @transform_11, window_bounds = array<i64: 64, 2>}, {pipeline_mode = #tpu.pipeline_mode<synchronous>, transform_indices = @transform_12, window_bounds = array<i64: 1, 2>}, {transform_indices = @transform_13, window_bounds = array<i64: 1, 1, 2>}]} {
    %c0 = arith.constant 0 : index
    %c0_0 = arith.constant 0 : index
    %0 = vector.load %arg3[%c0, %c0_0] : memref<1x224xf32, #tpu.memory_space<vmem>>, vector<1x224xf32>
    %c0_1 = arith.constant 0 : index
    %c0_2 = arith.constant 0 : index
    %c0_3 = arith.constant 0 : index
    %1 = vector.load %arg1[%c0_1, %c0_2, %c0_3] : memref<1x30x30xf32, #tpu.memory_space<vmem>>, vector<1x28x30xf32>
    %2 = vector.shape_cast %1 : vector<1x28x30xf32> to vector<28x30xf32>
    %c0_4 = arith.constant 0 : index
    %c0_5 = arith.constant 0 : index
    %c0_6 = arith.constant 0 : index
    %3 = vector.load %arg2[%c0_4, %c0_5, %c0_6] : memref<3x30x224xf32, #tpu.memory_space<vmem>>, vector<1x30x224xf32>
    %4 = vector.shape_cast %3 : vector<1x30x224xf32> to vector<30x224xf32>
    %cst = arith.constant dense<0.000000e+00> : vector<28x224xf32>
    %5 = tpu.matmul %2, %4, %cst {dimension_numbers = #tpu.dot_dimension_numbers<[1], [0], [0], [1], [0, 0, 1, 1], [], []>} : vector<28x30xf32>, vector<30x224xf32>, vector<28x224xf32> -> vector<28x224xf32>
    %6 = vector.broadcast %0 : vector<1x224xf32> to vector<28x224xf32>
    %7 = arith.addf %6, %5 : vector<28x224xf32>
    %c0_7 = arith.constant 0 : index
    %c1 = arith.constant 1 : index
    %c0_8 = arith.constant 0 : index
    %8 = vector.load %arg1[%c0_7, %c1, %c0_8] : memref<1x30x30xf32, #tpu.memory_space<vmem>>, vector<1x28x30xf32>
    %9 = vector.shape_cast %8 : vector<1x28x30xf32> to vector<28x30xf32>
    %c1_9 = arith.constant 1 : index
    %c0_10 = arith.constant 0 : index
    %c0_11 = arith.constant 0 : index
    %10 = vector.load %arg2[%c1_9, %c0_10, %c0_11] : memref<3x30x224xf32, #tpu.memory_space<vmem>>, vector<1x30x224xf32>
    %11 = vector.shape_cast %10 : vector<1x30x224xf32> to vector<30x224xf32>
    %cst_12 = arith.constant dense<0.000000e+00> : vector<28x224xf32>
    %12 = tpu.matmul %9, %11, %cst_12 {dimension_numbers = #tpu.dot_dimension_numbers<[1], [0], [0], [1], [0, 0, 1, 1], [], []>} : vector<28x30xf32>, vector<30x224xf32>, vector<28x224xf32> -> vector<28x224xf32>
    %13 = arith.addf %7, %12 : vector<28x224xf32>
    %c0_13 = arith.constant 0 : index
    %c2 = arith.constant 2 : index
    %c0_14 = arith.constant 0 : index
    %14 = vector.load %arg1[%c0_13, %c2, %c0_14] : memref<1x30x30xf32, #tpu.memory_space<vmem>>, vector<1x28x30xf32>
    %15 = vector.shape_cast %14 : vector<1x28x30xf32> to vector<28x30xf32>
    %c2_15 = arith.constant 2 : index
    %c0_16 = arith.constant 0 : index
    %c0_17 = arith.constant 0 : index
    %16 = vector.load %arg2[%c2_15, %c0_16, %c0_17] : memref<3x30x224xf32, #tpu.memory_space<vmem>>, vector<1x30x224xf32>
    %17 = vector.shape_cast %16 : vector<1x30x224xf32> to vector<30x224xf32>
    %cst_18 = arith.constant dense<0.000000e+00> : vector<28x224xf32>
    %18 = tpu.matmul %15, %17, %cst_18 {dimension_numbers = #tpu.dot_dimension_numbers<[1], [0], [0], [1], [0, 0, 1, 1], [], []>} : vector<28x30xf32>, vector<30x224xf32>, vector<28x224xf32> -> vector<28x224xf32>
    %19 = arith.addf %13, %18 : vector<28x224xf32>
    %cst_19 = arith.constant 0.000000e+00 : f32
    %20 = vector.broadcast %cst_19 : f32 to vector<28x224xf32>
    %21 = arith.cmpf ogt, %19, %20 : vector<28x224xf32>
    %cst_20 = arith.constant 3.300000e-01 : f32
    %22 = vector.broadcast %cst_20 : f32 to vector<28x224xf32>
    %23 = arith.mulf %22, %19 : vector<28x224xf32>
    %24 = arith.select %21, %19, %23 : vector<28x224xi1>, vector<28x224xf32>
    %c0_21 = arith.constant 0 : index
    %c0_22 = arith.constant 0 : index
    %c0_23 = arith.constant 0 : index
    %25 = vector.load %arg4[%c0_21, %c0_22, %c0_23] : memref<2x224x112xf32, #tpu.memory_space<vmem>>, vector<1x224x112xf32>
    %26 = vector.shape_cast %25 : vector<1x224x112xf32> to vector<224x112xf32>
    %cst_24 = arith.constant dense<0.000000e+00> : vector<28x112xf32>
    %27 = tpu.matmul %24, %26, %cst_24 {dimension_numbers = #tpu.dot_dimension_numbers<[1], [0], [0], [1], [0, 0, 1, 1], [], []>} : vector<28x224xf32>, vector<224x112xf32>, vector<28x112xf32> -> vector<28x112xf32>
    %c1_25 = arith.constant 1 : index
    %c0_26 = arith.constant 0 : index
    %c0_27 = arith.constant 0 : index
    %28 = vector.load %arg4[%c1_25, %c0_26, %c0_27] : memref<2x224x112xf32, #tpu.memory_space<vmem>>, vector<1x224x112xf32>
    %29 = vector.shape_cast %28 : vector<1x224x112xf32> to vector<224x112xf32>
    %cst_28 = arith.constant dense<0.000000e+00> : vector<28x112xf32>
    %30 = tpu.matmul %24, %29, %cst_28 {dimension_numbers = #tpu.dot_dimension_numbers<[1], [0], [0], [1], [0, 0, 1, 1], [], []>} : vector<28x224xf32>, vector<224x112xf32>, vector<28x112xf32> -> vector<28x112xf32>
    %31 = arith.maximumf %27, %30 : vector<28x112xf32>
    %c0_29 = arith.constant 0 : index
    %c0_30 = arith.constant 0 : index
    %c0_31 = arith.constant 0 : index
    %32 = vector.load %arg5[%c0_29, %c0_30, %c0_31] : memref<2x14x28xf32, #tpu.memory_space<vmem>>, vector<1x14x28xf32>
    %33 = vector.shape_cast %32 : vector<1x14x28xf32> to vector<14x28xf32>
    %cst_32 = arith.constant dense<0.000000e+00> : vector<14x112xf32>
    %34 = tpu.matmul %33, %31, %cst_32 {dimension_numbers = #tpu.dot_dimension_numbers<[1], [0], [0], [1], [0, 0, 1, 1], [], []>} : vector<14x28xf32>, vector<28x112xf32>, vector<14x112xf32> -> vector<14x112xf32>
    %c1_33 = arith.constant 1 : index
    %c0_34 = arith.constant 0 : index
    %c0_35 = arith.constant 0 : index
    %35 = vector.load %arg5[%c1_33, %c0_34, %c0_35] : memref<2x14x28xf32, #tpu.memory_space<vmem>>, vector<1x14x28xf32>
    %36 = vector.shape_cast %35 : vector<1x14x28xf32> to vector<14x28xf32>
    %cst_36 = arith.constant dense<0.000000e+00> : vector<14x112xf32>
    %37 = tpu.matmul %36, %31, %cst_36 {dimension_numbers = #tpu.dot_dimension_numbers<[1], [0], [0], [1], [0, 0, 1, 1], [], []>} : vector<14x28xf32>, vector<28x112xf32>, vector<14x112xf32> -> vector<14x112xf32>
    %38 = arith.maximumf %34, %37 : vector<14x112xf32>
    %c0_37 = arith.constant 0 : index
    %c0_38 = arith.constant 0 : index
    %39 = vector.load %arg15[%c0_37, %c0_38] : memref<14x112xf32, #tpu.memory_space<vmem>>, vector<14x112xf32>
    tpu.vector_store %arg15[%c0_37, %c0_38], %38 {strides = array<i32>} : memref<14x112xf32, #tpu.memory_space<vmem>>, vector<14x112xf32>,
    %c0_39 = arith.constant 0 : index
    %c0_40 = arith.constant 0 : index
    %40 = vector.load %arg7[%c0_39, %c0_40] : memref<1x192xf32, #tpu.memory_space<vmem>>, vector<1x192xf32>
    %c0_41 = arith.constant 0 : index
    %c0_42 = arith.constant 0 : index
    %41 = vector.load %arg15[%c0_41, %c0_42] : memref<14x112xf32, #tpu.memory_space<vmem>>, vector<12x112xf32>
    %c0_43 = arith.constant 0 : index
    %c0_44 = arith.constant 0 : index
    %c0_45 = arith.constant 0 : index
    %42 = vector.load %arg6[%c0_43, %c0_44, %c0_45] : memref<3x112x192xf32, #tpu.memory_space<vmem>>, vector<1x112x192xf32>
    %43 = vector.shape_cast %42 : vector<1x112x192xf32> to vector<112x192xf32>
    %cst_46 = arith.constant dense<0.000000e+00> : vector<12x192xf32>
    %44 = tpu.matmul %41, %43, %cst_46 {dimension_numbers = #tpu.dot_dimension_numbers<[1], [0], [0], [1], [0, 0, 1, 1], [], []>} : vector<12x112xf32>, vector<112x192xf32>, vector<12x192xf32> -> vector<12x192xf32>
    %45 = vector.broadcast %40 : vector<1x192xf32> to vector<12x192xf32>
    %46 = arith.addf %45, %44 : vector<12x192xf32>
    %c1_47 = arith.constant 1 : index
    %c0_48 = arith.constant 0 : index
    %47 = vector.load %arg15[%c1_47, %c0_48] : memref<14x112xf32, #tpu.memory_space<vmem>>, vector<12x112xf32>
    %c1_49 = arith.constant 1 : index
    %c0_50 = arith.constant 0 : index
    %c0_51 = arith.constant 0 : index
    %48 = vector.load %arg6[%c1_49, %c0_50, %c0_51] : memref<3x112x192xf32, #tpu.memory_space<vmem>>, vector<1x112x192xf32>
    %49 = vector.shape_cast %48 : vector<1x112x192xf32> to vector<112x192xf32>
    %cst_52 = arith.constant dense<0.000000e+00> : vector<12x192xf32>
    %50 = tpu.matmul %47, %49, %cst_52 {dimension_numbers = #tpu.dot_dimension_numbers<[1], [0], [0], [1], [0, 0, 1, 1], [], []>} : vector<12x112xf32>, vector<112x192xf32>, vector<12x192xf32> -> vector<12x192xf32>
    %51 = arith.addf %46, %50 : vector<12x192xf32>
    %c2_53 = arith.constant 2 : index
    %c0_54 = arith.constant 0 : index
    %52 = vector.load %arg15[%c2_53, %c0_54] : memref<14x112xf32, #tpu.memory_space<vmem>>, vector<12x112xf32>
    %c2_55 = arith.constant 2 : index
    %c0_56 = arith.constant 0 : index
    %c0_57 = arith.constant 0 : index
    %53 = vector.load %arg6[%c2_55, %c0_56, %c0_57] : memref<3x112x192xf32, #tpu.memory_space<vmem>>, vector<1x112x192xf32>
    %54 = vector.shape_cast %53 : vector<1x112x192xf32> to vector<112x192xf32>
    %cst_58 = arith.constant dense<0.000000e+00> : vector<12x192xf32>
    %55 = tpu.matmul %52, %54, %cst_58 {dimension_numbers = #tpu.dot_dimension_numbers<[1], [0], [0], [1], [0, 0, 1, 1], [], []>} : vector<12x112xf32>, vector<112x192xf32>, vector<12x192xf32> -> vector<12x192xf32>
    %56 = arith.addf %51, %55 : vector<12x192xf32>
    %cst_59 = arith.constant 0.000000e+00 : f32
    %57 = vector.broadcast %cst_59 : f32 to vector<12x192xf32>
    %58 = arith.cmpf ogt, %56, %57 : vector<12x192xf32>
    %cst_60 = arith.constant 3.300000e-01 : f32
    %59 = vector.broadcast %cst_60 : f32 to vector<12x192xf32>
    %60 = arith.mulf %59, %56 : vector<12x192xf32>
    %61 = arith.select %58, %56, %60 : vector<12x192xi1>, vector<12x192xf32>
    %c0_61 = arith.constant 0 : index
    %c0_62 = arith.constant 0 : index
    %c0_63 = arith.constant 0 : index
    %62 = vector.load %arg8[%c0_61, %c0_62, %c0_63] : memref<2x192x96xf32, #tpu.memory_space<vmem>>, vector<1x192x96xf32>
    %63 = vector.shape_cast %62 : vector<1x192x96xf32> to vector<192x96xf32>
    %cst_64 = arith.constant dense<0.000000e+00> : vector<12x96xf32>
    %64 = tpu.matmul %61, %63, %cst_64 {dimension_numbers = #tpu.dot_dimension_numbers<[1], [0], [0], [1], [0, 0, 1, 1], [], []>} : vector<12x192xf32>, vector<192x96xf32>, vector<12x96xf32> -> vector<12x96xf32>
    %c1_65 = arith.constant 1 : index
    %c0_66 = arith.constant 0 : index
    %c0_67 = arith.constant 0 : index
    %65 = vector.load %arg8[%c1_65, %c0_66, %c0_67] : memref<2x192x96xf32, #tpu.memory_space<vmem>>, vector<1x192x96xf32>
    %66 = vector.shape_cast %65 : vector<1x192x96xf32> to vector<192x96xf32>
    %cst_68 = arith.constant dense<0.000000e+00> : vector<12x96xf32>
    %67 = tpu.matmul %61, %66, %cst_68 {dimension_numbers = #tpu.dot_dimension_numbers<[1], [0], [0], [1], [0, 0, 1, 1], [], []>} : vector<12x192xf32>, vector<192x96xf32>, vector<12x96xf32> -> vector<12x96xf32>
    %68 = arith.maximumf %64, %67 : vector<12x96xf32>
    %c0_69 = arith.constant 0 : index
    %c0_70 = arith.constant 0 : index
    %c0_71 = arith.constant 0 : index
    %69 = vector.load %arg9[%c0_69, %c0_70, %c0_71] : memref<2x6x12xf32, #tpu.memory_space<vmem>>, vector<1x6x12xf32>
    %70 = vector.shape_cast %69 : vector<1x6x12xf32> to vector<6x12xf32>
    %cst_72 = arith.constant dense<0.000000e+00> : vector<6x96xf32>
    %71 = tpu.matmul %70, %68, %cst_72 {dimension_numbers = #tpu.dot_dimension_numbers<[1], [0], [0], [1], [0, 0, 1, 1], [], []>} : vector<6x12xf32>, vector<12x96xf32>, vector<6x96xf32> -> vector<6x96xf32>
    %c1_73 = arith.constant 1 : index
    %c0_74 = arith.constant 0 : index
    %c0_75 = arith.constant 0 : index
    %72 = vector.load %arg9[%c1_73, %c0_74, %c0_75] : memref<2x6x12xf32, #tpu.memory_space<vmem>>, vector<1x6x12xf32>
    %73 = vector.shape_cast %72 : vector<1x6x12xf32> to vector<6x12xf32>
    %cst_76 = arith.constant dense<0.000000e+00> : vector<6x96xf32>
    %74 = tpu.matmul %73, %68, %cst_76 {dimension_numbers = #tpu.dot_dimension_numbers<[1], [0], [0], [1], [0, 0, 1, 1], [], []>} : vector<6x12xf32>, vector<12x96xf32>, vector<6x96xf32> -> vector<6x96xf32>
    %75 = arith.maximumf %71, %74 : vector<6x96xf32>
    %c0_77 = arith.constant 0 : index
    %c0_78 = arith.constant 0 : index
    %76 = vector.load %arg16[%c0_77, %c0_78] : memref<6x96xf32, #tpu.memory_space<vmem>>, vector<6x96xf32>
    tpu.vector_store %arg16[%c0_77, %c0_78], %75 {strides = array<i32>} : memref<6x96xf32, #tpu.memory_space<vmem>>, vector<6x96xf32>,
    %c0_79 = arith.constant 0 : index
    %c0_80 = arith.constant 0 : index
    %77 = vector.load %arg11[%c0_79, %c0_80] : memref<1x64xf32, #tpu.memory_space<vmem>>, vector<1x64xf32>
    %c0_81 = arith.constant 0 : index
    %c0_82 = arith.constant 0 : index
    %78 = vector.load %arg16[%c0_81, %c0_82] : memref<6x96xf32, #tpu.memory_space<vmem>>, vector<1x96xf32>
    %c0_83 = arith.constant 0 : index
    %c0_84 = arith.constant 0 : index
    %c0_85 = arith.constant 0 : index
    %79 = vector.load %arg10[%c0_83, %c0_84, %c0_85] : memref<6x96x64xf32, #tpu.memory_space<vmem>>, vector<1x96x64xf32>
    %80 = vector.shape_cast %79 : vector<1x96x64xf32> to vector<96x64xf32>
    %cst_86 = arith.constant dense<0.000000e+00> : vector<1x64xf32>
    %81 = tpu.matmul %78, %80, %cst_86 {dimension_numbers = #tpu.dot_dimension_numbers<[1], [0], [0], [1], [0, 0, 1, 1], [], []>} : vector<1x96xf32>, vector<96x64xf32>, vector<1x64xf32> -> vector<1x64xf32>
    %82 = arith.addf %77, %81 : vector<1x64xf32>
    %c1_87 = arith.constant 1 : index
    %c0_88 = arith.constant 0 : index
    %83 = vector.load %arg16[%c1_87, %c0_88] : memref<6x96xf32, #tpu.memory_space<vmem>>, vector<1x96xf32>
    %c1_89 = arith.constant 1 : index
    %c0_90 = arith.constant 0 : index
    %c0_91 = arith.constant 0 : index
    %84 = vector.load %arg10[%c1_89, %c0_90, %c0_91] : memref<6x96x64xf32, #tpu.memory_space<vmem>>, vector<1x96x64xf32>
    %85 = vector.shape_cast %84 : vector<1x96x64xf32> to vector<96x64xf32>
    %cst_92 = arith.constant dense<0.000000e+00> : vector<1x64xf32>
    %86 = tpu.matmul %83, %85, %cst_92 {dimension_numbers = #tpu.dot_dimension_numbers<[1], [0], [0], [1], [0, 0, 1, 1], [], []>} : vector<1x96xf32>, vector<96x64xf32>, vector<1x64xf32> -> vector<1x64xf32>
    %87 = arith.addf %82, %86 : vector<1x64xf32>
    %c2_93 = arith.constant 2 : index
    %c0_94 = arith.constant 0 : index
    %88 = vector.load %arg16[%c2_93, %c0_94] : memref<6x96xf32, #tpu.memory_space<vmem>>, vector<1x96xf32>
    %c2_95 = arith.constant 2 : index
    %c0_96 = arith.constant 0 : index
    %c0_97 = arith.constant 0 : index
    %89 = vector.load %arg10[%c2_95, %c0_96, %c0_97] : memref<6x96x64xf32, #tpu.memory_space<vmem>>, vector<1x96x64xf32>
    %90 = vector.shape_cast %89 : vector<1x96x64xf32> to vector<96x64xf32>
    %cst_98 = arith.constant dense<0.000000e+00> : vector<1x64xf32>
    %91 = tpu.matmul %88, %90, %cst_98 {dimension_numbers = #tpu.dot_dimension_numbers<[1], [0], [0], [1], [0, 0, 1, 1], [], []>} : vector<1x96xf32>, vector<96x64xf32>, vector<1x64xf32> -> vector<1x64xf32>
    %92 = arith.addf %87, %91 : vector<1x64xf32>
    %c3 = arith.constant 3 : index
    %c0_99 = arith.constant 0 : index
    %93 = vector.load %arg16[%c3, %c0_99] : memref<6x96xf32, #tpu.memory_space<vmem>>, vector<1x96xf32>
    %c3_100 = arith.constant 3 : index
    %c0_101 = arith.constant 0 : index
    %c0_102 = arith.constant 0 : index
    %94 = vector.load %arg10[%c3_100, %c0_101, %c0_102] : memref<6x96x64xf32, #tpu.memory_space<vmem>>, vector<1x96x64xf32>
    %95 = vector.shape_cast %94 : vector<1x96x64xf32> to vector<96x64xf32>
    %cst_103 = arith.constant dense<0.000000e+00> : vector<1x64xf32>
    %96 = tpu.matmul %93, %95, %cst_103 {dimension_numbers = #tpu.dot_dimension_numbers<[1], [0], [0], [1], [0, 0, 1, 1], [], []>} : vector<1x96xf32>, vector<96x64xf32>, vector<1x64xf32> -> vector<1x64xf32>
    %97 = arith.addf %92, %96 : vector<1x64xf32>
    %c4 = arith.constant 4 : index
    %c0_104 = arith.constant 0 : index
    %98 = vector.load %arg16[%c4, %c0_104] : memref<6x96xf32, #tpu.memory_space<vmem>>, vector<1x96xf32>
    %c4_105 = arith.constant 4 : index
    %c0_106 = arith.constant 0 : index
    %c0_107 = arith.constant 0 : index
    %99 = vector.load %arg10[%c4_105, %c0_106, %c0_107] : memref<6x96x64xf32, #tpu.memory_space<vmem>>, vector<1x96x64xf32>
    %100 = vector.shape_cast %99 : vector<1x96x64xf32> to vector<96x64xf32>
    %cst_108 = arith.constant dense<0.000000e+00> : vector<1x64xf32>
    %101 = tpu.matmul %98, %100, %cst_108 {dimension_numbers = #tpu.dot_dimension_numbers<[1], [0], [0], [1], [0, 0, 1, 1], [], []>} : vector<1x96xf32>, vector<96x64xf32>, vector<1x64xf32> -> vector<1x64xf32>
    %102 = arith.addf %97, %101 : vector<1x64xf32>
    %c5 = arith.constant 5 : index
    %c0_109 = arith.constant 0 : index
    %103 = vector.load %arg16[%c5, %c0_109] : memref<6x96xf32, #tpu.memory_space<vmem>>, vector<1x96xf32>
    %c5_110 = arith.constant 5 : index
    %c0_111 = arith.constant 0 : index
    %c0_112 = arith.constant 0 : index
    %104 = vector.load %arg10[%c5_110, %c0_111, %c0_112] : memref<6x96x64xf32, #tpu.memory_space<vmem>>, vector<1x96x64xf32>
    %105 = vector.shape_cast %104 : vector<1x96x64xf32> to vector<96x64xf32>
    %cst_113 = arith.constant dense<0.000000e+00> : vector<1x64xf32>
    %106 = tpu.matmul %103, %105, %cst_113 {dimension_numbers = #tpu.dot_dimension_numbers<[1], [0], [0], [1], [0, 0, 1, 1], [], []>} : vector<1x96xf32>, vector<96x64xf32>, vector<1x64xf32> -> vector<1x64xf32>
    %107 = arith.addf %102, %106 : vector<1x64xf32>
    %cst_114 = arith.constant 0.000000e+00 : f32
    %108 = vector.broadcast %cst_114 : f32 to vector<1x64xf32>
    %109 = arith.cmpf ogt, %107, %108 : vector<1x64xf32>
    %cst_115 = arith.constant 3.300000e-01 : f32
    %110 = vector.broadcast %cst_115 : f32 to vector<1x64xf32>
    %111 = arith.mulf %110, %107 : vector<1x64xf32>
    %112 = arith.select %109, %107, %111 : vector<1x64xi1>, vector<1x64xf32>
    %c0_116 = arith.constant 0 : index
    %c0_117 = arith.constant 0 : index
    %113 = vector.load %arg12[%c0_116, %c0_117] : memref<64x2xf32, #tpu.memory_space<vmem>>, vector<64x2xf32>
    %cst_118 = arith.constant dense<0.000000e+00> : vector<1x2xf32>
    %114 = tpu.matmul %112, %113, %cst_118 {dimension_numbers = #tpu.dot_dimension_numbers<[1], [0], [0], [1], [0, 0, 1, 1], [], []>} : vector<1x64xf32>, vector<64x2xf32>, vector<1x2xf32> -> vector<1x2xf32>
    %c0_119 = arith.constant 0 : index
    %c0_120 = arith.constant 0 : index
    %115 = vector.load %arg13[%c0_119, %c0_120] : memref<1x2xf32, #tpu.memory_space<vmem>>, vector<1x2xf32>
    %116 = arith.addf %114, %115 : vector<1x2xf32>
    %cst_121 = arith.constant dense<0xFF800000> : vector<1xf32>
    %117 = vector.multi_reduction <maximumf>, %116, %cst_121 [1] : vector<1x2xf32> to vector<1xf32>
    %118 = vector.shape_cast %117 : vector<1xf32> to vector<1x1xf32>
    %119 = vector.broadcast %118 : vector<1x1xf32> to vector<1x2xf32>
    %120 = arith.subf %116, %119 : vector<1x2xf32>
    %121 = math.exp %120 : vector<1x2xf32>
    %cst_122 = arith.constant dense<0.000000e+00> : vector<1xf32>
    %122 = vector.multi_reduction <add>, %121, %cst_122 [1] : vector<1x2xf32> to vector<1xf32>
    %123 = vector.shape_cast %122 : vector<1xf32> to vector<1x1xf32>
    %124 = math.log %123 : vector<1x1xf32>
    %125 = vector.broadcast %124 : vector<1x1xf32> to vector<1x2xf32>
    %126 = arith.subf %120, %125 : vector<1x2xf32>
    %c0_123 = arith.constant 0 : index
    %c0_124 = arith.constant 0 : index
    %c0_125 = arith.constant 0 : index
    %127 = vector.load %arg14[%c0_123, %c0_124, %c0_125] : memref<1x1x2xf32, #tpu.memory_space<vmem>>, vector<1x1x2xf32>
    %128 = vector.shape_cast %127 : vector<1x1x2xf32> to vector<1x2xf32>
    %129 = vector.shape_cast %126 : vector<1x2xf32> to vector<1x1x2xf32>
    tpu.vector_store %arg14[%c0_123, %c0_124, %c0_125], %129 {strides = array<i32>} : memref<1x1x2xf32, #tpu.memory_space<vmem>>, vector<1x1x2xf32>,
    return
  }
  func.func @transform_0(%arg0: i32) -> (i32, i32, i32) {
    %c0_i32 = arith.constant 0 : i32
    %c0_i32_0 = arith.constant 0 : i32
    %c0_i32_1 = arith.constant 0 : i32
    return %arg0, %c0_i32, %c0_i32_0 : i32, i32, i32
  }
  func.func @transform_1(%arg0: i32) -> (i32, i32, i32) {
    %c0_i32 = arith.constant 0 : i32
    %c0_i32_0 = arith.constant 0 : i32
    %c0_i32_1 = arith.constant 0 : i32
    %c0_i32_2 = arith.constant 0 : i32
    return %c0_i32, %c0_i32_0, %c0_i32_1 : i32, i32, i32
  }
  func.func @transform_2(%arg0: i32) -> (i32, i32) {
    %c0_i32 = arith.constant 0 : i32
    %c0_i32_0 = arith.constant 0 : i32
    %c0_i32_1 = arith.constant 0 : i32
    return %c0_i32, %c0_i32_0 : i32, i32
  }
  func.func @transform_3(%arg0: i32) -> (i32, i32, i32) {
    %c0_i32 = arith.constant 0 : i32
    %c0_i32_0 = arith.constant 0 : i32
    %c0_i32_1 = arith.constant 0 : i32
    %c0_i32_2 = arith.constant 0 : i32
    return %c0_i32, %c0_i32_0, %c0_i32_1 : i32, i32, i32
  }
  func.func @transform_4(%arg0: i32) -> (i32, i32, i32) {
    %c0_i32 = arith.constant 0 : i32
    %c0_i32_0 = arith.constant 0 : i32
    %c0_i32_1 = arith.constant 0 : i32
    %c0_i32_2 = arith.constant 0 : i32
    return %c0_i32, %c0_i32_0, %c0_i32_1 : i32, i32, i32
  }
  func.func @transform_5(%arg0: i32) -> (i32, i32, i32) {
    %c0_i32 = arith.constant 0 : i32
    %c0_i32_0 = arith.constant 0 : i32
    %c0_i32_1 = arith.constant 0 : i32
    %c0_i32_2 = arith.constant 0 : i32
    return %c0_i32, %c0_i32_0, %c0_i32_1 : i32, i32, i32
  }
  func.func @transform_6(%arg0: i32) -> (i32, i32) {
    %c0_i32 = arith.constant 0 : i32
    %c0_i32_0 = arith.constant 0 : i32
    %c0_i32_1 = arith.constant 0 : i32
    return %c0_i32, %c0_i32_0 : i32, i32
  }
  func.func @transform_7(%arg0: i32) -> (i32, i32, i32) {
    %c0_i32 = arith.constant 0 : i32
    %c0_i32_0 = arith.constant 0 : i32
    %c0_i32_1 = arith.constant 0 : i32
    %c0_i32_2 = arith.constant 0 : i32
    return %c0_i32, %c0_i32_0, %c0_i32_1 : i32, i32, i32
  }
  func.func @transform_8(%arg0: i32) -> (i32, i32, i32) {
    %c0_i32 = arith.constant 0 : i32
    %c0_i32_0 = arith.constant 0 : i32
    %c0_i32_1 = arith.constant 0 : i32
    %c0_i32_2 = arith.constant 0 : i32
    return %c0_i32, %c0_i32_0, %c0_i32_1 : i32, i32, i32
  }
  func.func @transform_9(%arg0: i32) -> (i32, i32, i32) {
    %c0_i32 = arith.constant 0 : i32
    %c0_i32_0 = arith.constant 0 : i32
    %c0_i32_1 = arith.constant 0 : i32
    %c0_i32_2 = arith.constant 0 : i32
    return %c0_i32, %c0_i32_0, %c0_i32_1 : i32, i32, i32
  }
  func.func @transform_10(%arg0: i32) -> (i32, i32) {
    %c0_i32 = arith.constant 0 : i32
    %c0_i32_0 = arith.constant 0 : i32
    %c0_i32_1 = arith.constant 0 : i32
    return %c0_i32, %c0_i32_0 : i32, i32
  }
  func.func @transform_11(%arg0: i32) -> (i32, i32) {
    %c0_i32 = arith.constant 0 : i32
    %c0_i32_0 = arith.constant 0 : i32
    %c0_i32_1 = arith.constant 0 : i32
    return %c0_i32, %c0_i32_0 : i32, i32
  }
  func.func @transform_12(%arg0: i32) -> (i32, i32) {
    %c0_i32 = arith.constant 0 : i32
    %c0_i32_0 = arith.constant 0 : i32
    %c0_i32_1 = arith.constant 0 : i32
    return %c0_i32, %c0_i32_0 : i32, i32
  }
  func.func @transform_13(%arg0: i32) -> (i32, i32, i32) {
    %c0_i32 = arith.constant 0 : i32
    %c0_i32_0 = arith.constant 0 : i32
    %c0_i32_1 = arith.constant 0 : i32
    return %arg0, %c0_i32, %c0_i32_0 : i32, i32, i32
  }
}

</mosaic_0001>

<bundles_post_ra>
// kernel: cnn_forward.1
= control target key start
LH: loop header
LB: loop body
LE: loop exit
PB: predicated region body
PF: predicated region fallthrough
CT: control target
= control target key end

     0   :  { %s4769_s0 = inlined_call_operand.vmem [shape: f32[2,30,30], index: 0, kind: input, shape index: {}]   ;;  %s4770_s1 = inlined_call_operand.vmem [shape: f32[3,30,224], index: 1, kind: input, shape index: {}]   ;;  %s4771_s2 = inlined_call_operand.vmem [shape: f32[1,224], index: 2, kind: input, shape index: {}]   ;;  %s4772_s3 = inlined_call_operand.vmem [shape: f32[2,224,112], index: 3, kind: input, shape index: {}]   ;;  %s4773_s4 = inlined_call_operand.vmem [shape: f32[2,14,28], index: 4, kind: input, shape index: {}]   ;;  %s4774_s5 = inlined_call_operand.vmem [shape: f32[3,112,192], index: 5, kind: input, shape index: {}]   ;;  %s4775_s6 = inlined_call_operand.vmem [shape: f32[1,192], index: 6, kind: input, shape index: {}]   ;;  %s4776_s7 = inlined_call_operand.vmem [shape: f32[2,192,96], index: 7, kind: input, shape index: {}]   ;;  %s4777_s8 = inlined_call_operand.vmem [shape: f32[2,6,12], index: 8, kind: input, shape index: {}]   ;;  %s4778_s9 = inlined_call_operand.vmem [shape: f32[6,96,64], index: 9, kind: input, shape index: {}]   ;;  %s4779_s10 = inlined_call_operand.vmem [shape: f32[1,64], index: 10, kind: input, shape index: {}]   ;;  %s4780_s11 = inlined_call_operand.vmem [shape: f32[64,2], index: 11, kind: input, shape index: {}]   ;;  %s4781_s12 = inlined_call_operand.vmem [shape: f32[1,2], index: 12, kind: input, shape index: {}]   ;;  %s4782_s13 = inlined_call_operand.hbm [shape: f32[2,1,2], index: 13, kind: output, shape index: {}]  }
   0x1   :  { %4784 = sst [smem:[#allocation9_spill]] %s4769_s0 }
   0x2   :  { %4785 = sst [smem:[#allocation10_spill]] %s4770_s1 }
   0x3   :  { %18 = vsyncpa [#allocation5], 0 }
   0x4   :  { %20 = vsyncpa [#allocation5 + $0x1], 0  ;;  %s3469_s25 = smov 0   ;;  %s3471_s26 = smov 0  }
   0x5   :  { %s3473_s27 = smov 0   ;;  %s3475_s28 = smov 0  }
   0x6 LB: > { %4786 = sst [smem:[#allocation7_spill]] %s3390_s27  ;;  %s3490_s29 = sadd.s32 4294967295, %s3394_s28   ;;  %s3394_s28 = sphi %s3475_s28, %s4796_s28   ;;  %s3390_s27 = sphi %s3473_s27, %s4793_s27   ;;  %s3386_s26 = sphi %s3471_s26, %s4795_s26   ;;  %s3382_s25 = sphi %s3469_s25, %s4794_s25  }
   0x7   : > { %s2717_s30 = sadd.s32 4294967294, %s3394_s28   ;;  %s3494_s14 = sadd.s32 1, %s3394_s28  }
   0x8   : > { %s311_s15 = sadd.s32 1, %s3390_s27  ;;  %s308_s16 = ssub.s32 %s3394_s28, %s3494_s14 }
   0x9   : > { %p321_p0 = scmp.ne.s32.totalorder %s3390_s27, %s3386_s26  ;;  %p309_p1 = scmp.eq.s32.totalorder %s308_s16, 0 }
   0xa   : > { %p322_p2 = scmp.eq.s32.totalorder %s3490_s29, 1  ;;  %p327_p3 = scmp.ne.s32.totalorder %s3386_s26, %s3382_s25 }
   0xb   : > { %p328_p4 = scmp.eq.s32.totalorder %s2717_s30, 1  ;;  %p2720_p7 = scmp.ge.s32.totalorder %s3394_s28, 1 }
   0xc   : > { %s3505_s17 = scalar_select %p309_p1, %s3390_s27, %s311_s15  }
   0xd   : > { %p3507_p5 = por %p322_p2, %p321_p0  ;;  %p3511_p6 = por %p328_p4, %p327_p3 }
   0xe   : > { %4787 = sst [smem:[#allocation8_spill]] %s3505_s17  ;;  %p390_p8 = scmp.lt.s32.totalorder %s3394_s28, 3 }
  0x10   : > { %p391_p9 = pnand %p2720_p7, %p390_p8 }
  0x11   : > { %s4790_s1 = sld [smem:[#allocation10_spill]] (!%p391_p9)  ;;  %p433_p10 = scmp.lt.s32.totalorder (!%p391_p9), %s3490_s29, 1 }
  0x12   : > { %394 = sbr.rel (%p391_p9) target bundleno = 2089 (0x829), region = 72  ;;  %s4791_s0 = sld [smem:[#allocation9_spill]] (!%p391_p9) }
  0x13   : > { %s2963_s23 = sshll.u32 (!%p391_p9), %s3490_s29, 4  ;;  %s3398_s22 = smov (!%p391_p9), [#allocation4]  }
  0x17   : > { %v450_v0 = vld [vmem:[%s4790_s1 + $0x38] sm:$0x3f]  ;;  %vm464_vm0 = vcmask 1045504   ;;  %v449_v1 = vld [vmem:[%s4790_s1 + $0x30] sm:$0x3f]  ;;  %v448_v2 = vld [vmem:[%s4790_s1 + $0x28] sm:$0xff] }
  0x18   : > { %2723 = vmatprep.subr.msk.mxu0 %vm464_vm0, %v450_v0  ;;  %v2736_v3 = vld [vmem:[%s4790_s1 + $0x78] sm:$0x3f]  ;;  %v447_v4 = vld [vmem:[%s4790_s1 + $0x20] sm:$0xff]  ;;  %v2735_v5 = vld [vmem:[%s4790_s1 + $0x70] sm:$0x3f]  ;;  %s434_s24 = scalar_select %p433_p10, %s3490_s29, 1 }
  0x19   : > { %2724 = vmatpush1.msk.msra.mxu0 %vm464_vm0, %v449_v1  ;;  %2737 = vmatprep.subr.msk.mxu1 %vm464_vm0, %v2736_v3  ;;  %v446_v6 = vld [vmem:[%s4790_s1 + $0x18] sm:$0xff]  ;;  %v2734_v7 = vld [vmem:[%s4790_s1 + $0x68] sm:$0xff]  ;;  %v445_v8 = vld [vmem:[%s4790_s1 + $0x10] sm:$0xff]  ;;  %vm451_vm1 = vcmask 244736   ;;  %v3396_v15 = vmov 0.0   ;;  %vm887_vm2 = vcmask 785408  }
  0x1a   : > { %497 = vmatprep.subr.mxu0 %v448_v2  ;;  %2738 = vmatpush1.msk.msra.mxu1 %vm464_vm0, %v2735_v5  ;;  %v2733_v9 = vld [vmem:[%s4790_s1 + $0x60] sm:$0xff]  ;;  %v2732_v10 = vld [vmem:[%s4790_s1 + $0x58] sm:$0xff]  ;;  %v444_v11 = vld [vmem:[%s4790_s1 + $0x8] sm:$0xff]  ;;  %s2966_s16 = sshll.u32 %s434_s24, 5  ;;  %vm1105_vm11 = vcmask 228352   ;;  %vm1112_vm12 = vcmask 1043456  }
  0x1b   : > { %498 = vmatpush1.msra.mxu0 %v447_v4  ;;  %636 = vmatprep.subr.mxu1 %v2734_v7  ;;  %v443_v12 = vld [vmem:[%s4790_s1] sm:$0xff]  ;;  %v2731_v13 = vld [vmem:[%s4790_s1 + $0x50] sm:$0xff]  ;;  %v2730_v14 = vld [vmem:[%s4790_s1 + $0x48] sm:$0xff]  ;;  %s3572_s30 = scalar_lea.vmem %s4791_s0, %s2966_s16  ;;  %vm1279_vm13 = vcmask 914432   ;;  %vm1277_vm14 = vcmask 916480   ;;  %vm1682_vm15 = vcmask 523264   ;;  %s2660_s16 = scalar_lea.hbm %s4782_s13, %s2963_s23 }
  0x1c   : > { %499 = vmatprep.subr.mxu0 %v446_v6  ;;  %637 = vmatpush1.msra.mxu1 %v2733_v9  ;;  %v2729_v16 = vld [vmem:[%s4790_s1 + $0x40] sm:$0xff]  ;;  %v2750_v19 = vld [vmem:[%s4790_s1 + $0xb8] sm:$0x3f]  ;;  %v440_v20 = vld [vmem:[%s3572_s30 + $0x8] sm:$0xff]  ;;  %s3338_s0 = sshll.u32 %s3398_s22, 4  ;;  %s3339_s0 = int_to_ptr.vmem [resolvable:$false] %s3338_s0 }
  0x1d   : > { %500 = vmatpush1.msra.mxu0 %v445_v8  ;;  %638 = vmatprep.subr.mxu1 %v2732_v10  ;;  %v439_v17 = vld [vmem:[%s3572_s30] sm:$0xff]  ;;  %v2749_v21 = vld [vmem:[%s4790_s1 + $0xb0] sm:$0x3f]  ;;  %v2748_v23 = vld [vmem:[%s4790_s1 + $0xa8] sm:$0xff]  ;;  %s3340_s29 = scalar_lea.vmem %s3339_s0, 32 }
  0x1e   : > { %501 = vmatprep.subr.mxu0 %v444_v11  ;;  %535 = vmatprep.mubr.f32.mxu0 %v3396_v15  ;;  %v579_v18 = vld [vmem:[%s3572_s30 + $0x1] sm:$0xff]  ;;  %v580_v22 = vld [vmem:[%s3572_s30 + $0x9] sm:$0xff]  ;;  %v2746_v26 = vld [vmem:[%s4790_s1 + $0x98] sm:$0xff] }
  0x1f   : > { %502 = vmatpush1.msra.mxu0 %v443_v12  ;;  %639 = vmatpush1.msra.mxu1 %v2731_v13  ;;  %v2747_v24 = vld [vmem:[%s4790_s1 + $0xa0] sm:$0xff]  ;;  %v441_v25 = vld [vmem:[%s3572_s30 + $0x10] sm:$0xff]  ;;  %v2744_v29 = vld [vmem:[%s4790_s1 + $0x88] sm:$0xff] }
  0x20   : > { %2725 = vmatmul.mubr.msk.f32.vlgmr.msra.gmra.mxu0 %vm451_vm1, %v439_v17  ;;  %640 = vmatprep.subr.mxu1 %v2730_v14  ;;  %v2745_v27 = vld [vmem:[%s4790_s1 + $0x90] sm:$0xff]  ;;  %v2743_v30 = vld [vmem:[%s4790_s1 + $0x80] sm:$0xff]  ;;  %v442_v31 = vld [vmem:[%s3572_s30 + $0x18] sm:$0xf] }
  0x21   : > { %641 = vmatpush1.msra.mxu1 %v2729_v16  ;;  %674 = vmatprep.mubr.f32.mxu1 %v3396_v15  ;;  %v581_v28 = vld [vmem:[%s3572_s30 + $0x11] sm:$0xff]  ;;  %v582_v33 = vld [vmem:[%s3572_s30 + $0x19] sm:$0xf]  ;;  %v707_v35 = vld [vmem:[%s3572_s30 + $0x2] sm:$0xff] }
  0x22   : > { %2739 = vmatmul.mubr.msk.f32.vlgmr.msra.gmra.mxu1 %vm451_vm1, %v579_v18  ;;  %541 = vmatprep.mubr.f32.mxu0 %v3396_v15  ;;  %v874_v32 = vld [vmem:[%s4772_s3 + $0x78] sm:$0xff]  ;;  %v873_v34 = vld [vmem:[%s4772_s3 + $0x70] sm:$0xff]  ;;  %v872_v37 = vld [vmem:[%s4772_s3 + $0x68] sm:$0xff] }
  0x23   : > { %680 = vmatprep.mubr.f32.mxu1 %v3396_v15  ;;  %2751 = vmatprep.subr.msk.mxu0 %vm464_vm0, %v2750_v19  ;;  %v2776_v36 = vld [vmem:[%s4772_s3 + $0x158] sm:$0xff]  ;;  %v2775_v38 = vld [vmem:[%s4772_s3 + $0x150] sm:$0xff]  ;;  %v2774_v40 = vld [vmem:[%s4772_s3 + $0x148] sm:$0xff] }
  0x24   : > { %2726 = vmatmul.mubr.msk.f32.gmra.mxu0 %vm451_vm1, %v440_v20  ;;  %900 = vmatprep.subr.mxu1 %v3396_v15  ;;  %v708_v39 = vld [vmem:[%s3572_s30 + $0xa] sm:$0xff]  ;;  %v871_v41 = vld [vmem:[%s4772_s3 + $0x60] sm:$0xff]  ;;  %v709_v43 = vld [vmem:[%s3572_s30 + $0x12] sm:$0xff] }
  0x25   : > { %547 = vmatprep.mubr.f32.mxu0 %v3396_v15  ;;  %2752 = vmatpush1.msk.msra.mxu0 %vm464_vm0, %v2749_v21  ;;  %v2773_v42 = vld [vmem:[%s4772_s3 + $0x140] sm:$0xff]  ;;  %v870_v44 = vld [vmem:[%s4772_s3 + $0x58] sm:$0xff]  ;;  %v869_v46 = vld [vmem:[%s4772_s3 + $0x50] sm:$0xff] }
  0x26   : > { %2740 = vmatmul.mubr.msk.f32.gmra.mxu1 %vm451_vm1, %v580_v22  ;;  %764 = vmatprep.subr.mxu0 %v2748_v23  ;;  %v2772_v45 = vld [vmem:[%s4772_s3 + $0x138] sm:$0xff]  ;;  %v2771_v48 = vld [vmem:[%s4772_s3 + $0x130] sm:$0xff]  ;;  %v868_v49 = vld [vmem:[%s4772_s3 + $0x48] sm:$0xff] }
  0x27   : > { %686 = vmatprep.mubr.f32.mxu1 %v3396_v15  ;;  %765 = vmatpush1.msra.mxu0 %v2747_v24  ;;  %v710_v47 = vld [vmem:[%s3572_s30 + $0x1a] sm:$0xf]  ;;  %v2770_v50 = vld [vmem:[%s4772_s3 + $0x128] sm:$0xff]  ;;  %v867_v51 = vld [vmem:[%s4772_s3 + $0x40] sm:$0xff]  ;;  %s431_s30 = sand.u32 1, %s3386_s26  }
  0x28   : > { %2727 = vmatmul.mubr.msk.f32.gmra.mxu0 %vm451_vm1, %v441_v25  ;;  %766 = vmatprep.subr.mxu0 %v2746_v26  ;;  %v2769_v52 = vld [vmem:[%s4772_s3 + $0x120] sm:$0xff]  ;;  %v866_v53 = vld [vmem:[%s4772_s3 + $0x38] sm:$0xff]  ;;  %v865_v55 = vld [vmem:[%s4772_s3 + $0x30] sm:$0xff]  ;;  %s432_s27 = scalar_lea.vmem [#allocation4], %s431_s30  ;;  %s2650_s20 = scalar_lea.sflag [#allocation5], %s431_s30 }
  0x29   : > { %553 = vmatprep.mubr.f32.mxu0 %v3396_v15  ;;  %767 = vmatpush1.msra.mxu0 %v2745_v27  ;;  %v2768_v54 = vld [vmem:[%s4772_s3 + $0x118] sm:$0xff]  ;;  %v2767_v56 = vld [vmem:[%s4772_s3 + $0x110] sm:$0xff]  ;;  %v864_v57 = vld [vmem:[%s4772_s3 + $0x28] sm:$0xff]  ;;  %s2662_s17 = sshll.u32 %s432_s27, 4  ;;  %s2663_s17 = int_to_ptr.vmem [resolvable:$true] %s2662_s17 }
  0x2a   : > { %2741 = vmatmul.mubr.msk.f32.gmra.mxu1 %vm451_vm1, %v581_v28  ;;  %768 = vmatprep.subr.mxu0 %v2744_v29  ;;  %v2766_v58 = vld [vmem:[%s4772_s3 + $0x108] sm:$0xff]  ;;  %v863_v59 = vld [vmem:[%s4772_s3 + $0x20] sm:$0xff]  ;;  %v862_v61 = vld [vmem:[%s4772_s3 + $0x18] sm:$0xff]  ;;  %s3334_s21 = scalar_lea.vmem %s2663_s17, 16  ;;  %p3341_p0 = scmp.lt.s32.totalorder %s2663_s17, %s3339_s0 }
  0x2b   : > { %692 = vmatprep.mubr.f32.mxu1 %v3396_v15  ;;  %769 = vmatpush1.msra.mxu0 %v2743_v30  ;;  %v2765_v60 = vld [vmem:[%s4772_s3 + $0x100] sm:$0xff]  ;;  %v2764_v62 = vld [vmem:[%s4772_s3 + $0xf8] sm:$0xff]  ;;  %v861_v63 = vld [vmem:[%s4772_s3 + $0x10] sm:$0xff]  ;;  %v561_v30 = vlaneseq  ;;  %p3335_p11 = scmp.ne.s32.totalorder %s2663_s17, %s3334_s21  ;;  %p3342_p1 = scmp.lt.s32.totalorder %s3340_s29, %s3334_s21 }
  0x2c   : > { %2728 = vmatmul.mubr.msk.f32.gmra.mxu0 %vm451_vm1, %v442_v31  ;;  %1014 = vmatprep.subr.mxu0 %v3396_v15  ;;  %v2763_v0 = vld [vmem:[%s4772_s3 + $0xf0] sm:$0xff]  ;;  %v860_v1 = vld [vmem:[%s4772_s3 + $0x8] sm:$0xff]  ;;  %v859_v3 = vld [vmem:[%s4772_s3] sm:$0xff] }
  0x2d   : > { %802 = vmatprep.mubr.f32.mxu0 %v3396_v15  ;;  %901 = vmatpush1.msra.mxu1 %v874_v32  ;;  %v2762_v2 = vld [vmem:[%s4772_s3 + $0xe8] sm:$0xff]  ;;  %v2761_v4 = vld [vmem:[%s4772_s3 + $0xe0] sm:$0xff]  ;;  %v886_v5 = vld [vmem:[%s4772_s3 + $0xd8] sm:$0xff]  ;;  %v3862_v31 = vshrl.u32 %v561_v30, 7  ;;  %p3336_p12 = pnand %p3335_p11, %p3507_p5  ;;  %p3343_p2 = por %p3342_p1, %p3341_p0 }
  0x2e   : > { %2742 = vmatmul.mubr.msk.f32.gmra.mxu1 %vm451_vm1, %v582_v33  ;;  %902 = vmatprep.subr.mxu1 %v3396_v15  ;;  %v2788_v6 = vld [vmem:[%s4772_s3 + $0x1b8] sm:$0xff]  ;;  %v885_v7 = vld [vmem:[%s4772_s3 + $0xd0] sm:$0xff]  ;;  %v884_v9 = vld [vmem:[%s4772_s3 + $0xc8] sm:$0xff] }
  0x2f   : > { %903 = vmatpush1.msra.mxu1 %v873_v34  ;;  %v2787_v8 = vld [vmem:[%s4772_s3 + $0x1b0] sm:$0xff]  ;;  %v2786_v10 = vld [vmem:[%s4772_s3 + $0x1a8] sm:$0xff]  ;;  %v883_v11 = vld [vmem:[%s4772_s3 + $0xc0] sm:$0xff]  ;;  %p3337_p13 = pneg %p3336_p12 }
  0x30   : > { %2753 = vmatmul.mubr.msk.f32.vlgmr.msra.gmra.mxu0 %vm451_vm1, %v707_v35  ;;  %904 = vmatprep.subr.mxu1 %v3396_v15  ;;  %v2785_v12 = vld [vmem:[%s4772_s3 + $0x1a0] sm:$0xff]  ;;  %v882_v13 = vld [vmem:[%s4772_s3 + $0xb8] sm:$0xff]  ;;  %v881_v16 = vld [vmem:[%s4772_s3 + $0xb0] sm:$0xff]  ;;  %v563_v35 = vsub.s32 0, %v3862_v31 }
  0x31   : > { %808 = vmatprep.mubr.f32.mxu0 %v3396_v15  ;;  %1015 = vmatpush1.msra.mxu0 %v2776_v36  ;;  %v2784_v14 = vld [vmem:[%s4772_s3 + $0x198] sm:$0xff]  ;;  %v2783_v17 = vld [vmem:[%s4772_s3 + $0x190] sm:$0xff]  ;;  %v880_v18 = vld [vmem:[%s4772_s3 + $0xa8] sm:$0xff]  ;;  %p3344_p3 = pnand %p3343_p2, %p3337_p13 }
  0x32   : > { %1016 = vmatprep.subr.mxu0 %v3396_v15  ;;  %905 = vmatpush1.msra.mxu1 %v872_v37  ;;  %v2782_v19 = vld [vmem:[%s4772_s3 + $0x188] sm:$0xff]  ;;  %v879_v20 = vld [vmem:[%s4772_s3 + $0xa0] sm:$0xff]  ;;  %v878_v22 = vld [vmem:[%s4772_s3 + $0x98] sm:$0xff] }
  0x33   : > { %1017 = vmatpush1.msra.mxu0 %v2775_v38  ;;  %906 = vmatprep.subr.mxu1 %v3396_v15  ;;  %v2781_v21 = vld [vmem:[%s4772_s3 + $0x180] sm:$0xff]  ;;  %v2780_v23 = vld [vmem:[%s4772_s3 + $0x178] sm:$0xff]  ;;  %v877_v24 = vld [vmem:[%s4772_s3 + $0x90] sm:$0xff] }
  0x34   : > { %2754 = vmatmul.mubr.msk.f32.gmra.mxu0 %vm451_vm1, %v708_v39  ;;  %1018 = vmatprep.subr.mxu0 %v3396_v15  ;;  %v2779_v25 = vld [vmem:[%s4772_s3 + $0x170] sm:$0xff]  ;;  %v876_v26 = vld [vmem:[%s4772_s3 + $0x88] sm:$0xff]  ;;  %v875_v28 = vld [vmem:[%s4772_s3 + $0x80] sm:$0xff]  ;;  %v567_v39 = vsub.s32 1, %v3862_v31 }
  0x35   : > { %814 = vmatprep.mubr.f32.mxu0 %v3396_v15  ;;  %1019 = vmatpush1.msra.mxu0 %v2774_v40  ;;  %v2778_v27 = vld [vmem:[%s4772_s3 + $0x168] sm:$0xff]  ;;  %v2777_v29 = vld [vmem:[%s4772_s3 + $0x160] sm:$0xff] }
  0x36   : > { %1020 = vmatprep.subr.mxu0 %v3396_v15  ;;  %907 = vmatpush1.msra.mxu1 %v871_v41  ;;  %v438_v36 = vld [vmem:[%s4771_s2] sm:$0x3] }
  0x37   : > { %1021 = vmatpush1.msra.mxu0 %v2773_v42  ;;  %908 = vmatprep.subr.mxu1 %v3396_v15  ;;  %v564_v42 = vrot.slane %v438_v36, %v563_v35 }
  0x38   : > { %2755 = vmatmul.mubr.msk.f32.gmra.mxu0 %vm451_vm1, %v709_v43  ;;  %1022 = vmatprep.subr.mxu0 %v3396_v15 }
  0x39   : > { %820 = vmatprep.mubr.f32.mxu0 %v3396_v15  ;;  %909 = vmatpush1.msra.mxu1 %v870_v44  ;;  %v568_v44 = vrot.slane %v438_v36, %v567_v39 }
  0x3a   : > { %1023 = vmatpush1.msra.mxu0 %v2772_v45  ;;  %910 = vmatprep.subr.mxu1 %v3396_v15 }
  0x3b   : > { %1024 = vmatprep.subr.mxu0 %v3396_v15  ;;  %911 = vmatpush1.msra.mxu1 %v869_v46 }
  0x3c   : > { %2756 = vmatmul.mubr.msk.f32.gmra.mxu0 %vm451_vm1, %v710_v47  ;;  %912 = vmatprep.subr.mxu1 %v3396_v15 }
  0x3d   : > { %1025 = vmatpush1.msra.mxu0 %v2771_v48  ;;  %913 = vmatpush1.msra.mxu1 %v868_v49 }
  0x3e   : > { %1026 = vmatprep.subr.mxu0 %v3396_v15  ;;  %914 = vmatprep.subr.mxu1 %v3396_v15 }
  0x3f   : > { %1027 = vmatpush1.msra.mxu0 %v2770_v50  ;;  %915 = vmatpush1.msra.mxu1 %v867_v51 }
  0x40   : > { %1028 = vmatprep.subr.mxu0 %v3396_v15  ;;  %916 = vmatprep.subr.mxu1 %v3396_v15 }
  0x41   : > { %1029 = vmatpush1.msra.mxu0 %v2769_v52  ;;  %917 = vmatpush1.msra.mxu1 %v866_v53 }
  0x42   : > { %1030 = vmatprep.subr.mxu0 %v3396_v15  ;;  %918 = vmatprep.subr.mxu1 %v3396_v15 }
  0x43   : > { %1031 = vmatpush1.msra.mxu0 %v2768_v54  ;;  %919 = vmatpush1.msra.mxu1 %v865_v55 }
  0x44   : > { %1032 = vmatprep.subr.mxu0 %v3396_v15  ;;  %920 = vmatprep.subr.mxu1 %v3396_v15 }
  0x45   : > { %1033 = vmatpush1.msra.mxu0 %v2767_v56  ;;  %921 = vmatpush1.msra.mxu1 %v864_v57 }
  0x46   : > { %1034 = vmatprep.subr.mxu0 %v3396_v15  ;;  %922 = vmatprep.subr.mxu1 %v3396_v15 }
  0x47   : > { %1035 = vmatpush1.msra.mxu0 %v2766_v58  ;;  %923 = vmatpush1.msra.mxu1 %v863_v59 }
  0x48   : > { %1036 = vmatprep.subr.mxu0 %v3396_v15  ;;  %924 = vmatprep.subr.mxu1 %v3396_v15 }
  0x49   : > { %1037 = vmatpush1.msra.mxu0 %v2765_v60  ;;  %925 = vmatpush1.msra.mxu1 %v862_v61 }
  0x4a   : > { %1038 = vmatprep.subr.mxu0 %v3396_v15  ;;  %926 = vmatprep.subr.mxu1 %v3396_v15 }
  0x4b   : > { %1039 = vmatpush1.msra.mxu0 %v2764_v62  ;;  %927 = vmatpush1.msra.mxu1 %v861_v63 }
  0x4c   : > { %1040 = vmatprep.subr.mxu0 %v3396_v15  ;;  %928 = vmatprep.subr.mxu1 %v3396_v15 }
  0x4d   : > { %1041 = vmatpush1.msra.mxu0 %v2763_v0  ;;  %929 = vmatpush1.msra.mxu1 %v860_v1 }
  0x4e   : > { %1042 = vmatprep.subr.mxu0 %v3396_v15  ;;  %930 = vmatprep.subr.mxu1 %v3396_v15 }
  0x4f   : > { %1043 = vmatpush1.msra.mxu0 %v2762_v2  ;;  %931 = vmatpush1.msra.mxu1 %v859_v3 }
  0x50   : > { %1044 = vmatprep.subr.mxu0 %v3396_v15  ;;  %940 = vmatprep.subr.mxu1 %v3396_v15 }
  0x51   : > { %1045 = vmatpush1.msra.mxu0 %v2761_v4  ;;  %941 = vmatpush2.msra.mxu1 %v886_v5 }
  0x52   : > { %1054 = vmatprep.subr.mxu0 %v3396_v15  ;;  %942 = vmatprep.subr.mxu1 %v3396_v15 }
  0x53   : > { %1055 = vmatpush2.msra.mxu0 %v2788_v6  ;;  %943 = vmatpush2.msra.mxu1 %v885_v7 }
  0x54   : > { %1056 = vmatprep.subr.mxu0 %v3396_v15  ;;  %944 = vmatprep.subr.mxu1 %v3396_v15 }
  0x55   : > { %1057 = vmatpush2.msra.mxu0 %v2787_v8  ;;  %945 = vmatpush2.msra.mxu1 %v884_v9 }
  0x56   : > { %1058 = vmatprep.subr.mxu0 %v3396_v15  ;;  %946 = vmatprep.subr.mxu1 %v3396_v15 }
  0x57   : > { %1059 = vmatpush2.msra.mxu0 %v2786_v10  ;;  %947 = vmatpush2.msra.mxu1 %v883_v11 }
  0x58   : > { %1060 = vmatprep.subr.mxu0 %v3396_v15  ;;  %948 = vmatprep.subr.mxu1 %v3396_v15 }
  0x59   : > { %1061 = vmatpush2.msra.mxu0 %v2785_v12  ;;  %949 = vmatpush2.msra.mxu1 %v882_v13 }
  0x5a   : > { %1062 = vmatprep.subr.mxu0 %v3396_v15  ;;  %950 = vmatprep.subr.mxu1 %v3396_v15 }
  0x5b   : > { %1063 = vmatpush2.msra.mxu0 %v2784_v14  ;;  %951 = vmatpush2.msra.mxu1 %v881_v16 }
  0x5c   : > { %1064 = vmatprep.subr.mxu0 %v3396_v15  ;;  %952 = vmatprep.subr.mxu1 %v3396_v15 }
  0x5d   : > { %1065 = vmatpush2.msra.mxu0 %v2783_v17  ;;  %953 = vmatpush2.msra.mxu1 %v880_v18 }
  0x5e   : > { %1066 = vmatprep.subr.mxu0 %v3396_v15  ;;  %954 = vmatprep.subr.mxu1 %v3396_v15 }
  0x5f   : > { %1067 = vmatpush2.msra.mxu0 %v2782_v19  ;;  %955 = vmatpush2.msra.mxu1 %v879_v20 }
  0x60   : > { %1068 = vmatprep.subr.mxu0 %v3396_v15  ;;  %956 = vmatprep.subr.mxu1 %v3396_v15 }
  0x61   : > { %1069 = vmatpush2.msra.mxu0 %v2781_v21  ;;  %957 = vmatpush2.msra.mxu1 %v878_v22 }
  0x62   : > { %1070 = vmatprep.subr.mxu0 %v3396_v15  ;;  %958 = vmatprep.subr.mxu1 %v3396_v15 }
  0x63   : > { %1071 = vmatpush2.msra.mxu0 %v2780_v23  ;;  %959 = vmatpush2.msra.mxu1 %v877_v24 }
  0x64   : > { %1072 = vmatprep.subr.mxu0 %v3396_v15  ;;  %960 = vmatprep.subr.mxu1 %v3396_v15 }
  0x65   : > { %1073 = vmatpush2.msra.mxu0 %v2779_v25  ;;  %961 = vmatpush2.msra.mxu1 %v876_v26 }
  0x66   : > { %1074 = vmatprep.subr.mxu0 %v3396_v15  ;;  %962 = vmatprep.subr.mxu1 %v3396_v15 }
  0x67   : > { %1075 = vmatpush2.msra.mxu0 %v2778_v27  ;;  %963 = vmatpush2.msra.mxu1 %v875_v28 }
  0x68   : > { %1076 = vmatprep.subr.mxu0 %v3396_v15 }
  0x69   : > { %1077 = vmatpush2.msra.mxu0 %v2777_v29 }
  0xe0   : > { %v537_v32 = vpop.f32.mrf.mxu0 }
  0xe1   : > { %v571_v47 = vadd.f32 %v564_v42, %v537_v32 }
  0xe2   : > { %v539_v33 = vpop.f32.mrf.mxu0  ;;  %v676_v34 = vpop.f32.mrf.mxu1 }
  0xe3   : > { %v572_v49 = vadd.f32 %v568_v44, %v539_v33  ;;  %v699_v52 = vadd.f32 %v676_v34, %v571_v47  ;;  %v1306_v47 = vld [vmem:[%s4774_s5 + $0xb0] sm:$0xff] }
  0xe4   : > { %v543_v37 = vpop.f32.mrf.mxu0  ;;  %v678_v38 = vpop.f32.mrf.mxu1 }
  0xe5   : > { %v573_v53 = vadd.f32 %v564_v42, %v543_v37  ;;  %v700_v56 = vadd.f32 %v678_v38, %v572_v49  ;;  %v1304_v49 = vld [vmem:[%s4774_s5 + $0xa0] sm:$0xff] }
  0xe6   : > { %v545_v40 = vpop.f32.mrf.mxu0  ;;  %v682_v41 = vpop.f32.mrf.mxu1 }
  0xe7   : > { %v574_v54 = vadd.f32 %v568_v44, %v545_v40  ;;  %v701_v60 = vadd.f32 %v682_v41, %v573_v53  ;;  %v1103_v41 = vld [vmem:[%s4773_s4] sm:$0xff] }
  0xe8   : > { %v549_v43 = vpop.f32.mrf.mxu0  ;;  %v684_v45 = vpop.f32.mrf.mxu1 }
  0xe9   : > { %v575_v61 = vadd.f32 %v564_v42, %v549_v43  ;;  %v702_v63 = vadd.f32 %v684_v45, %v574_v54  ;;  %v1310_v43 = vld [vmem:[%s4774_s5 + $0xd0] sm:$0xff]  ;;  %v1308_v45 = vld [vmem:[%s4774_s5 + $0xc0] sm:$0xff] }
  0xea   : > { %v551_v46 = vpop.f32.mrf.mxu0  ;;  %v688_v50 = vpop.f32.mrf.mxu1 }
  0xeb   : > { %v576_v0 = vadd.f32 %v568_v44, %v551_v46  ;;  %v703_v7 = vadd.f32 %v688_v50, %v575_v61  ;;  %v1307_v46 = vld [vmem:[%s4774_s5 + $0xb8] sm:$0xff] }
  0xec   : > { %v555_v48 = vpop.f32.mrf.mxu0  ;;  %v690_v57 = vpop.f32.mrf.mxu1  ;;  %v1303_v50 = vld [vmem:[%s4774_s5 + $0x98] sm:$0xff] }
  0xed   : > { %v577_v8 = vadd.f32 %v564_v42, %v555_v48  ;;  %v704_v11 = vadd.f32 %v690_v57, %v576_v0  ;;  %v1311_v42 = vld [vmem:[%s4774_s5 + $0xd8] sm:$0xff]  ;;  %v1305_v48 = vld [vmem:[%s4774_s5 + $0xa8] sm:$0xff] }
  0xee   : > { %v557_v51 = vpop.f32.mrf.mxu0  ;;  %v694_v3 = vpop.f32.mrf.mxu1  ;;  %1322 = vmatprep.subr.mxu0 %v1311_v42  ;;  %v1292_v42 = vld [vmem:[%s4774_s5 + $0x40] sm:$0xff] }
  0xef   : > { %v578_v12 = vadd.f32 %v568_v44, %v557_v51  ;;  %v705_v21 = vadd.f32 %v694_v3, %v577_v8  ;;  %v1309_v44 = vld [vmem:[%s4774_s5 + $0xc8] sm:$0xff]  ;;  %v1302_v51 = vld [vmem:[%s4774_s5 + $0x90] sm:$0xff] }
  0xf0   : > { %v804_v55 = vpop.f32.mrf.mxu0  ;;  %v696_v17 = vpop.f32.mrf.mxu1  ;;  %v1104_v8 = vld [vmem:[%s4773_s4 + $0x8] sm:$0x3f] }
  0xf1   : > { %v827_v58 = vadd.f32 %v804_v55, %v699_v52  ;;  %v706_v24 = vadd.f32 %v696_v17, %v578_v12  ;;  %v2829_v12 = vld [vmem:[%s4774_s5 + $0x1b0] sm:$0xff] }
  0xf2   : > { %v806_v59 = vpop.f32.mrf.mxu0  ;;  %v2825_v17 = vld [vmem:[%s4774_s5 + $0x190] sm:$0xff] }
  0xf3   : > { %v828_v62 = vadd.f32 %v806_v59, %v700_v56  ;;  %v843_v1 = vmul.f32 0.33, %v827_v58  ;;  %vm835_vm3 = vcmp.gt.f32.partialorder %v827_v58, 0.0 }
  0xf4   : > { %v810_v2 = vpop.f32.mrf.mxu0 }
  0xf5   : > { %vm836_vm4 = vcmp.gt.f32.partialorder %v828_v62, 0.0  ;;  %v844_v4 = vmul.f32 0.33, %v828_v62  ;;  %v829_v5 = vadd.f32 %v810_v2, %v701_v60  ;;  %v851_v13 = vsel %vm835_vm3, %v827_v58, %v843_v1 }
  0xf6   : > { %v812_v6 = vpop.f32.mrf.mxu0 }
  0xf7   : > { %v830_v9 = vadd.f32 %v812_v6, %v702_v63  ;;  %v852_v10 = vsel %vm836_vm4, %v828_v62, %v844_v4  ;;  %v845_v14 = vmul.f32 0.33, %v829_v5  ;;  %vm837_vm6 = vcmp.gt.f32.partialorder %v829_v5, 0.0 }
  0xf8   : > { %v816_v16 = vpop.f32.mrf.mxu0  ;;  %2757 = vmatprep.mubr.msk.f32.mxu1 %vm887_vm2, %v852_v10  ;;  %2789 = vmatprep.mubr.msk.f32.mxu0 %vm887_vm2, %v852_v10  ;;  %v2797_v10 = vld [vmem:[%s4773_s4 + $0x18] sm:$0x3f] }
  0xf9   : > { %vm838_vm5 = vcmp.gt.f32.partialorder %v830_v9, 0.0  ;;  %v846_v18 = vmul.f32 0.33, %v830_v9  ;;  %v831_v19 = vadd.f32 %v816_v16, %v703_v7  ;;  %965 = vmatmul.mubr.f32.vlgmr.msra.gmra.mxu1 %v851_v13  ;;  %1079 = vmatmul.mubr.f32.vlgmr.msra.gmra.mxu0 %v851_v13  ;;  %v853_v27 = vsel %vm837_vm6, %v829_v5, %v845_v14  ;;  %v2828_v13 = vld [vmem:[%s4774_s5 + $0x1a8] sm:$0xff]  ;;  %v2827_v14 = vld [vmem:[%s4774_s5 + $0x1a0] sm:$0xff]  ;;  %v2826_v16 = vld [vmem:[%s4774_s5 + $0x198] sm:$0xff] }
  0xfa   : > { %v818_v20 = vpop.f32.mrf.mxu0  ;;  %1323 = vmatpush1.msra.mxu0 %v1310_v43  ;;  %v2812_v43 = vld [vmem:[%s4774_s5 + $0x128] sm:$0xff]  ;;  %vm1867_vm6 = vcmask 97280  }
  0xfb   : > { %v832_v22 = vadd.f32 %v818_v20, %v704_v11  ;;  %v854_v23 = vsel %vm838_vm5, %v830_v9, %v846_v18  ;;  %v847_v25 = vmul.f32 0.33, %v831_v19  ;;  %vm839_vm8 = vcmp.gt.f32.partialorder %v831_v19, 0.0  ;;  %1324 = vmatprep.subr.mxu0 %v1309_v44  ;;  %v2796_v9 = vld [vmem:[%s4773_s4 + $0x10] sm:$0xff]  ;;  %v2830_v11 = vld [vmem:[%s4774_s5 + $0x1b8] sm:$0xff]  ;;  %v2824_v18 = vld [vmem:[%s4774_s5 + $0x188] sm:$0xff] }
  0xfc   : > { %v822_v26 = vpop.f32.mrf.mxu0  ;;  %2758 = vmatprep.mubr.msk.f32.mxu1 %vm887_vm2, %v854_v23  ;;  %2790 = vmatprep.mubr.msk.f32.mxu0 %vm887_vm2, %v854_v23  ;;  %v2822_v20 = vld [vmem:[%s4774_s5 + $0x178] sm:$0xff]  ;;  %v1300_v23 = vld [vmem:[%s4774_s5 + $0x80] sm:$0xff]  ;;  %vm3397_vm5 = vmmov 0  }
  0xfd   : > { %vm840_vm7 = vcmp.gt.f32.partialorder %v832_v22, 0.0  ;;  %v848_v28 = vmul.f32 0.33, %v832_v22  ;;  %v833_v29 = vadd.f32 %v822_v26, %v705_v21  ;;  %970 = vmatmul.mubr.f32.gmra.mxu1 %v853_v27  ;;  %1084 = vmatmul.mubr.f32.gmra.mxu0 %v853_v27  ;;  %v855_v36 = vsel %vm839_vm8, %v831_v19, %v847_v25  ;;  %v2823_v19 = vld [vmem:[%s4774_s5 + $0x180] sm:$0xff]  ;;  %v1301_v21 = vld [vmem:[%s4774_s5 + $0x88] sm:$0xff]  ;;  %v1299_v25 = vld [vmem:[%s4774_s5 + $0x78] sm:$0xff] }
  0xfe   : > { %v824_v30 = vpop.f32.mrf.mxu0  ;;  %1325 = vmatpush1.msra.mxu0 %v1308_v45  ;;  %v2819_v26 = vld [vmem:[%s4774_s5 + $0x160] sm:$0xff]  ;;  %v1298_v27 = vld [vmem:[%s4774_s5 + $0x70] sm:$0xff]  ;;  %v1291_v44 = vld [vmem:[%s4774_s5 + $0x38] sm:$0xff]  ;;  %vm2635_vm8 = vcmask 8192  }
  0xff   : > { %v834_v32 = vadd.f32 %v824_v30, %v706_v24  ;;  %v856_v33 = vsel %vm840_vm7, %v832_v22, %v848_v28  ;;  %v849_v34 = vmul.f32 0.33, %v833_v29  ;;  %vm841_vm10 = vcmp.gt.f32.partialorder %v833_v29, 0.0  ;;  %1326 = vmatprep.subr.mxu0 %v1307_v46  ;;  %v2821_v22 = vld [vmem:[%s4774_s5 + $0x170] sm:$0xff]  ;;  %v2820_v24 = vld [vmem:[%s4774_s5 + $0x168] sm:$0xff]  ;;  %v2818_v28 = vld [vmem:[%s4774_s5 + $0x158] sm:$0xff] }
 0x100   : > { %2759 = vmatprep.mubr.msk.f32.mxu1 %vm887_vm2, %v856_v33  ;;  %2791 = vmatprep.mubr.msk.f32.mxu0 %vm887_vm2, %v856_v33  ;;  %v2817_v30 = vld [vmem:[%s4774_s5 + $0x150] sm:$0xff]  ;;  %v2816_v33 = vld [vmem:[%s4774_s5 + $0x148] sm:$0xff]  ;;  %v2811_v45 = vld [vmem:[%s4774_s5 + $0x120] sm:$0xff]  ;;  %vm2020_vm7 = vcmask 783360  }
 0x101   : > { %vm842_vm9 = vcmp.gt.f32.partialorder %v834_v32, 0.0  ;;  %v850_v37 = vmul.f32 0.33, %v834_v32  ;;  %975 = vmatmul.mubr.f32.gmra.mxu1 %v855_v36  ;;  %1089 = vmatmul.mubr.f32.gmra.mxu0 %v855_v36  ;;  %v857_v40 = vsel %vm841_vm10, %v833_v29, %v849_v34  ;;  %v1297_v29 = vld [vmem:[%s4774_s5 + $0x68] sm:$0xff]  ;;  %v1295_v34 = vld [vmem:[%s4774_s5 + $0x58] sm:$0xff]  ;;  %v2815_v36 = vld [vmem:[%s4774_s5 + $0x140] sm:$0xff] }
 0x102   : > { %1327 = vmatpush1.msra.mxu0 %v1306_v47  ;;  %v1290_v46 = vld [vmem:[%s4774_s5 + $0x30] sm:$0xff]  ;;  %v2810_v47 = vld [vmem:[%s4774_s5 + $0x118] sm:$0xff] }
 0x103   : > { %v858_v38 = vsel %vm842_vm9, %v834_v32, %v850_v37  ;;  %1328 = vmatprep.subr.mxu0 %v1305_v48  ;;  %v1296_v32 = vld [vmem:[%s4774_s5 + $0x60] sm:$0xff]  ;;  %v1294_v37 = vld [vmem:[%s4774_s5 + $0x50] sm:$0xff]  ;;  %v1289_v48 = vld [vmem:[%s4774_s5 + $0x28] sm:$0xff] }
 0x104   : > { %2760 = vmatprep.mubr.msk.f32.mxu1 %vm887_vm2, %v858_v38  ;;  %2792 = vmatprep.mubr.msk.f32.mxu0 %vm887_vm2, %v858_v38  ;;  %v2814_v38 = vld [vmem:[%s4774_s5 + $0x138] sm:$0xff] }
 0x105   : > { %980 = vmatmul.mubr.f32.gmra.mxu1 %v857_v40  ;;  %1094 = vmatmul.mubr.f32.gmra.mxu0 %v857_v40  ;;  %v1293_v40 = vld [vmem:[%s4774_s5 + $0x48] sm:$0xff] }
 0x106   : > { %1382 = vmatprep.mubr.f32.mxu0 %v3396_v15  ;;  %3080 = vmatprep.mubr.msk.f32.mxu1 %vm1105_vm11, %v1103_v41  ;;  %v2813_v41 = vld [vmem:[%s4774_s5 + $0x130] sm:$0xff] }
 0x107   : > { %1329 = vmatpush1.msra.mxu0 %v1304_v49  ;;  %v2809_v49 = vld [vmem:[%s4774_s5 + $0x110] sm:$0xff] }
 0x108   : > { %1330 = vmatprep.subr.mxu0 %v1303_v50  ;;  %v1288_v50 = vld [vmem:[%s4774_s5 + $0x20] sm:$0xff] }
 0x109   : > { %1331 = vmatpush1.msra.mxu0 %v1302_v51  ;;  %v2808_v51 = vld [vmem:[%s4774_s5 + $0x108] sm:$0xff] }
 0x10a   : > { %1332 = vmatprep.subr.mxu0 %v1301_v21  ;;  %v1671_v21 = vld [vmem:[%s4776_s7 + $0x68] sm:$0xff] }
 0x10b   : > { %1333 = vmatpush1.msra.mxu0 %v1300_v23  ;;  %v2848_v23 = vld [vmem:[%s4774_s5 + $0x238] sm:$0xff] }
 0x10c   : > { %1334 = vmatprep.subr.mxu0 %v1299_v25  ;;  %v2847_v25 = vld [vmem:[%s4774_s5 + $0x230] sm:$0xff] }
 0x10d   : > { %1335 = vmatpush1.msra.mxu0 %v1298_v27  ;;  %v1669_v27 = vld [vmem:[%s4776_s7 + $0x58] sm:$0xff] }
 0x10e   : > { %1336 = vmatprep.subr.mxu0 %v1297_v29  ;;  %v2844_v29 = vld [vmem:[%s4774_s5 + $0x218] sm:$0xff] }
 0x10f   : > { %1337 = vmatpush1.msra.mxu0 %v1296_v32  ;;  %v2843_v32 = vld [vmem:[%s4774_s5 + $0x210] sm:$0xff] }
 0x110   : > { %1338 = vmatprep.subr.mxu0 %v1295_v34  ;;  %v2841_v34 = vld [vmem:[%s4774_s5 + $0x200] sm:$0xff] }
 0x111   : > { %1339 = vmatpush1.msra.mxu0 %v1294_v37  ;;  %v2839_v37 = vld [vmem:[%s4774_s5 + $0x1f0] sm:$0xff] }
 0x112   : > { %1340 = vmatprep.subr.mxu0 %v1293_v40  ;;  %v2837_v40 = vld [vmem:[%s4774_s5 + $0x1e0] sm:$0xff] }
 0x113   : > { %1341 = vmatpush1.msra.mxu0 %v1292_v42  ;;  %v2835_v42 = vld [vmem:[%s4774_s5 + $0x1d0] sm:$0xff] }
 0x114   : > { %1342 = vmatprep.subr.mxu0 %v1291_v44  ;;  %v2833_v44 = vld [vmem:[%s4774_s5 + $0x1c0] sm:$0xff] }
 0x115   : > { %1343 = vmatpush1.msra.mxu0 %v1290_v46 }
 0x116   : > { %1344 = vmatprep.subr.mxu0 %v1289_v48  ;;  %v2878_v48 = vld [vmem:[%s4776_s7 + $0x128] sm:$0xff] }
 0x117   : > { %1345 = vmatpush1.msra.mxu0 %v1288_v50  ;;  %v2877_v50 = vld [vmem:[%s4776_s7 + $0x120] sm:$0xff] }
 0x1b9   : > { %v966_v52 = vpop.f32.mrf.mxu1  ;;  %v1080_v53 = vpop.f32.mrf.mxu0 }
 0x1ba   : > { %v1099_v7 = vmax.f32 %v966_v52, %v1080_v53  ;;  %v1287_v52 = vld [vmem:[%s4774_s5 + $0x18] sm:$0xff]  ;;  %v2807_v53 = vld [vmem:[%s4774_s5 + $0x100] sm:$0xff] }
 0x1bb   : > { %v968_v54 = vpop.f32.mrf.mxu1  ;;  %v1082_v55 = vpop.f32.mrf.mxu0  ;;  %1346 = vmatprep.subr.mxu0 %v1287_v52  ;;  %v2875_v52 = vld [vmem:[%s4776_s7 + $0x110] sm:$0xff] }
 0x1bc   : > { %v1286_v54 = vld [vmem:[%s4774_s5 + $0x10] sm:$0xff]  ;;  %v2806_v55 = vld [vmem:[%s4774_s5 + $0xf8] sm:$0xff] }
 0x1bd   : > { %v971_v56 = vpop.f32.mrf.mxu1  ;;  %v1085_v57 = vpop.f32.mrf.mxu0  ;;  %1347 = vmatpush1.msra.mxu0 %v1286_v54  ;;  %v2874_v54 = vld [vmem:[%s4776_s7 + $0x108] sm:$0xff] }
 0x1be   : > { %v1100_v6 = vmax.f32 %v971_v56, %v1085_v57  ;;  %v1285_v56 = vld [vmem:[%s4774_s5 + $0x8] sm:$0xff]  ;;  %v2805_v57 = vld [vmem:[%s4774_s5 + $0xf0] sm:$0xff] }
 0x1bf   : > { %v973_v58 = vpop.f32.mrf.mxu1  ;;  %v1087_v59 = vpop.f32.mrf.mxu0  ;;  %1348 = vmatprep.subr.mxu0 %v1285_v56  ;;  %v2873_v56 = vld [vmem:[%s4776_s7 + $0x100] sm:$0xff] }
 0x1c0   : > { %v1284_v58 = vld [vmem:[%s4774_s5] sm:$0xff]  ;;  %v2804_v59 = vld [vmem:[%s4774_s5 + $0xe8] sm:$0xff] }
 0x1c1   : > { %v976_v60 = vpop.f32.mrf.mxu1  ;;  %v1090_v61 = vpop.f32.mrf.mxu0  ;;  %1349 = vmatpush1.msra.mxu0 %v1284_v58  ;;  %v2872_v58 = vld [vmem:[%s4776_s7 + $0xf8] sm:$0xff] }
 0x1c2   : > { %v1101_v5 = vmax.f32 %v976_v60, %v1090_v61  ;;  %v2803_v60 = vld [vmem:[%s4774_s5 + $0xe0] sm:$0xff]  ;;  %v2860_v61 = vld [vmem:[%s4774_s5 + $0x298] sm:$0xff] }
 0x1c3   : > { %v978_v62 = vpop.f32.mrf.mxu1  ;;  %v1092_v63 = vpop.f32.mrf.mxu0  ;;  %1569 = vmatprep.subr.mxu0 %v2860_v61  ;;  %v1663_v61 = vld [vmem:[%s4776_s7 + $0x28] sm:$0xff] }
 0x1c5   : > { %v981_v0 = vpop.f32.mrf.mxu1  ;;  %v1095_v1 = vpop.f32.mrf.mxu0 }
 0x1c6   : > { %v1102_v2 = vmax.f32 %v981_v0, %v1095_v1 }
 0x1c7   : > { %v983_v3 = vpop.f32.mrf.mxu1  ;;  %v1097_v4 = vpop.f32.mrf.mxu0 }
 0x1c8   : > { %3072 = vmatprep.subr.msk.mxu1 %vm1112_vm12, %v1102_v2  ;;  %v2859_v4 = vld [vmem:[%s4774_s5 + $0x290] sm:$0xff] }
 0x1c9   : > { %3073 = vmatpush3.msk.msra.mxu1 %vm1112_vm12, %v1102_v2 }
 0x1ca   : > { %3074 = vmatprep.subr.mxu1 %v1101_v5 }
 0x1cb   : > { %3075 = vmatpush3.msra.mxu1 %v1101_v5 }
 0x1cc   : > { %3076 = vmatprep.subr.mxu1 %v1100_v6 }
 0x1cd   : > { %3077 = vmatpush3.msra.mxu1 %v1100_v6 }
 0x1ce   : > { %3078 = vmatprep.subr.mxu1 %v1099_v7 }
 0x1cf   : > { %3079 = vmatpush3.msra.mxu1 %v1099_v7 }
 0x1d0   : > { %3083 = vmatprep.subr.msk.mxu1 %vm1112_vm12, %v1102_v2  ;;  %3081 = vmatmul.mubr.msk.f32.vlgmr.msra.gmra.mxu1 %vm1105_vm11, %v1104_v8  ;;  %v2857_v8 = vld [vmem:[%s4774_s5 + $0x280] sm:$0xff] }
 0x1d1   : > { %3084 = vmatpush3.msk.msra.mxu1 %vm1112_vm12, %v1102_v2  ;;  %3091 = vmatprep.mubr.msk.f32.mxu1 %vm1105_vm11, %v2796_v9  ;;  %v1673_v9 = vld [vmem:[%s4776_s7 + $0x78] sm:$0xff] }
 0x1d2   : > { %3085 = vmatprep.subr.mxu1 %v1101_v5 }
 0x1d3   : > { %3086 = vmatpush3.msra.mxu1 %v1101_v5 }
 0x1d4   : > { %3087 = vmatprep.subr.mxu1 %v1100_v6 }
 0x1d5   : > { %3088 = vmatpush3.msra.mxu1 %v1100_v6 }
 0x1d6   : > { %3089 = vmatprep.subr.mxu1 %v1099_v7 }
 0x1d7   : > { %3090 = vmatpush3.msra.mxu1 %v1099_v7  ;;  %v2858_v7 = vld [vmem:[%s4774_s5 + $0x288] sm:$0xff] }
 0x1d8   : > { %3092 = vmatmul.mubr.msk.f32.vlgmr.msra.gmra.mxu1 %vm1105_vm11, %v2797_v10  ;;  %1451 = vmatprep.subr.mxu1 %v2830_v11  ;;  %v2856_v10 = vld [vmem:[%s4774_s5 + $0x278] sm:$0xff]  ;;  %v2855_v11 = vld [vmem:[%s4774_s5 + $0x270] sm:$0xff] }
 0x1d9   : > { %1452 = vmatpush1.msra.mxu1 %v2829_v12  ;;  %1511 = vmatprep.mubr.f32.mxu1 %v3396_v15 }
 0x1da   : > { %1453 = vmatprep.subr.mxu1 %v2828_v13  ;;  %v2854_v13 = vld [vmem:[%s4774_s5 + $0x268] sm:$0xff] }
 0x1db   : > { %1454 = vmatpush1.msra.mxu1 %v2827_v14 }
 0x1dc   : > { %1455 = vmatprep.subr.mxu1 %v2826_v16  ;;  %v2853_v16 = vld [vmem:[%s4774_s5 + $0x260] sm:$0xff] }
 0x1dd   : > { %1456 = vmatpush1.msra.mxu1 %v2825_v17  ;;  %v2852_v17 = vld [vmem:[%s4774_s5 + $0x258] sm:$0xff] }
 0x1de   : > { %1457 = vmatprep.subr.mxu1 %v2824_v18  ;;  %v1672_v18 = vld [vmem:[%s4776_s7 + $0x70] sm:$0xff] }
 0x1df   : > { %1458 = vmatpush1.msra.mxu1 %v2823_v19  ;;  %v2851_v19 = vld [vmem:[%s4774_s5 + $0x250] sm:$0xff] }
 0x1e0   : > { %1459 = vmatprep.subr.mxu1 %v2822_v20  ;;  %v2850_v20 = vld [vmem:[%s4774_s5 + $0x248] sm:$0xff] }
 0x1e1   : > { %1460 = vmatpush1.msra.mxu1 %v2821_v22  ;;  %v2849_v22 = vld [vmem:[%s4774_s5 + $0x240] sm:$0xff] }
 0x1e2   : > { %1461 = vmatprep.subr.mxu1 %v2820_v24  ;;  %v1670_v24 = vld [vmem:[%s4776_s7 + $0x60] sm:$0xff] }
 0x1e3   : > { %1462 = vmatpush1.msra.mxu1 %v2819_v26  ;;  %v2846_v26 = vld [vmem:[%s4774_s5 + $0x228] sm:$0xff] }
 0x1e4   : > { %1463 = vmatprep.subr.mxu1 %v2818_v28  ;;  %v2845_v28 = vld [vmem:[%s4774_s5 + $0x220] sm:$0xff] }
 0x1e5   : > { %1464 = vmatpush1.msra.mxu1 %v2817_v30  ;;  %v1668_v30 = vld [vmem:[%s4776_s7 + $0x50] sm:$0xff] }
 0x1e6   : > { %1465 = vmatprep.subr.mxu1 %v2816_v33  ;;  %v2842_v33 = vld [vmem:[%s4774_s5 + $0x208] sm:$0xff] }
 0x1e7   : > { %1466 = vmatpush1.msra.mxu1 %v2815_v36  ;;  %v2840_v36 = vld [vmem:[%s4774_s5 + $0x1f8] sm:$0xff] }
 0x1e8   : > { %1467 = vmatprep.subr.mxu1 %v2814_v38  ;;  %v2838_v38 = vld [vmem:[%s4774_s5 + $0x1e8] sm:$0xff] }
 0x1e9   : > { %1468 = vmatpush1.msra.mxu1 %v2813_v41  ;;  %v2836_v41 = vld [vmem:[%s4774_s5 + $0x1d8] sm:$0xff] }
 0x1ea   : > { %1469 = vmatprep.subr.mxu1 %v2812_v43  ;;  %v2834_v43 = vld [vmem:[%s4774_s5 + $0x1c8] sm:$0xff] }
 0x1eb   : > { %1470 = vmatpush1.msra.mxu1 %v2811_v45  ;;  %v2880_v45 = vld [vmem:[%s4776_s7 + $0x138] sm:$0xff] }
 0x1ec   : > { %1471 = vmatprep.subr.mxu1 %v2810_v47  ;;  %v2879_v47 = vld [vmem:[%s4776_s7 + $0x130] sm:$0xff] }
 0x1ed   : > { %1472 = vmatpush1.msra.mxu1 %v2809_v49 }
 0x1ee   : > { %1473 = vmatprep.subr.mxu1 %v2808_v51  ;;  %v2876_v51 = vld [vmem:[%s4776_s7 + $0x118] sm:$0xff] }
 0x1ef   : > { %1474 = vmatpush1.msra.mxu1 %v2807_v53  ;;  %v1667_v53 = vld [vmem:[%s4776_s7 + $0x48] sm:$0xff] }
 0x1f0   : > { %1475 = vmatprep.subr.mxu1 %v2806_v55  ;;  %v1666_v55 = vld [vmem:[%s4776_s7 + $0x40] sm:$0xff] }
 0x1f1   : > { %1476 = vmatpush1.msra.mxu1 %v2805_v57  ;;  %v1665_v57 = vld [vmem:[%s4776_s7 + $0x38] sm:$0xff] }
 0x1f2   : > { %1477 = vmatprep.subr.mxu1 %v2804_v59  ;;  %v1664_v59 = vld [vmem:[%s4776_s7 + $0x30] sm:$0xff] }
 0x1f3   : > { %1478 = vmatpush1.msra.mxu1 %v2803_v60  ;;  %v2871_v60 = vld [vmem:[%s4776_s7 + $0xf0] sm:$0xff] }
 0x1f4   : > { %1689 = vmatprep.subr.mxu1 %v3396_v15 }
 0x290   : > { %v3082_v62 = vpop.f32.mrf.mxu1 }
 0x292   : > { %v1182_v63 = vpop.f32.mrf.mxu1 }
 0x298   : > { %v3093_v0 = vpop.f32.mrf.mxu1 }
 0x299   : > { %v1276_v1 = vmax.f32 %v3082_v62, %v3093_v0  ;;  %v2870_v62 = vld [vmem:[%s4776_s7 + $0xe8] sm:$0xff]  ;;  %v2869_v0 = vld [vmem:[%s4776_s7 + $0xe0] sm:$0xff] }
 0x29a   : > { %v1266_v2 = vpop.f32.mrf.mxu1 }
 0x29b   : > { %1280 = vst.msk [vmem:[#allocation2 + $0x8] sm:$0x3f] %vm1279_vm13, %v1276_v1  ;;  %v1275_v3 = vmax.f32 %v1182_v63, %v1266_v2  ;;  %v1662_v63 = vld [vmem:[%s4776_s7 + $0x20] sm:$0xff]  ;;  %v1661_v1 = vld [vmem:[%s4776_s7 + $0x18] sm:$0xff] }
 0x29c   : > { %v2868_v2 = vld [vmem:[%s4776_s7 + $0xd8] sm:$0xff] }
 0x29d   : > { %1278 = vst.msk [vmem:[#allocation2] sm:$0xff] %vm1277_vm14, %v1275_v3  ;;  %v1660_v3 = vld [vmem:[%s4776_s7 + $0x10] sm:$0xff] }
 0x2a2   : > { %v1283_v12 = vld [vmem:[#allocation2 + $0x8] sm:$0xf] }
 0x2a3   : > { %v1411_v14 = vld [vmem:[#allocation2 + $0x9] sm:$0xf] }
 0x2a4   : > { %v1282_v5 = vld [vmem:[#allocation2] sm:$0xff]  ;;  %v1529_v49 = vld [vmem:[#allocation2 + $0xa] sm:$0xf] }
 0x2a5   : > { %v1410_v6 = vld [vmem:[#allocation2 + $0x1] sm:$0xff]  ;;  %2801 = vmatmul.mubr.msk.f32.vlgmr.msra.gmra.mxu0 %vm1277_vm14, %v1282_v5 }
 0x2a6   : > { %2831 = vmatmul.mubr.msk.f32.vlgmr.msra.gmra.mxu1 %vm1277_vm14, %v1410_v6  ;;  %1570 = vmatpush1.msra.mxu0 %v2859_v4  ;;  %v1528_v46 = vld [vmem:[#allocation2 + $0x2] sm:$0xff]  ;;  %v2867_v4 = vld [vmem:[%s4776_s7 + $0xd0] sm:$0xff] }
 0x2a7   : > { %1388 = vmatprep.mubr.f32.mxu0 %v3396_v15  ;;  %1571 = vmatprep.subr.mxu0 %v2858_v7  ;;  %v1659_v5 = vld [vmem:[%s4776_s7 + $0x8] sm:$0xff]  ;;  %v1658_v7 = vld [vmem:[%s4776_s7] sm:$0xff] }
 0x2a8   : > { %1517 = vmatprep.mubr.f32.mxu1 %v3396_v15  ;;  %1572 = vmatpush1.msra.mxu0 %v2857_v8  ;;  %v2866_v6 = vld [vmem:[%s4776_s7 + $0xc8] sm:$0xff]  ;;  %v2865_v8 = vld [vmem:[%s4776_s7 + $0xc0] sm:$0xff] }
 0x2a9   : > { %1690 = vmatpush1.msra.mxu1 %v1673_v9  ;;  %1573 = vmatprep.subr.mxu0 %v2856_v10  ;;  %v1681_v9 = vld [vmem:[%s4776_s7 + $0xb8] sm:$0xff] }
 0x2aa   : > { %2802 = vmatmul.mubr.msk.f32.gmra.mxu0 %vm1277_vm14, %v1283_v12  ;;  %2832 = vmatmul.mubr.msk.f32.gmra.mxu1 %vm1277_vm14, %v1411_v14  ;;  %v2888_v10 = vld [vmem:[%s4776_s7 + $0x178] sm:$0xff]  ;;  %v2887_v12 = vld [vmem:[%s4776_s7 + $0x170] sm:$0xff]  ;;  %v2886_v14 = vld [vmem:[%s4776_s7 + $0x168] sm:$0xff] }
 0x2ab   : > { %1574 = vmatpush1.msra.mxu0 %v2855_v11  ;;  %1629 = vmatprep.mubr.f32.mxu0 %v3396_v15  ;;  %v1680_v11 = vld [vmem:[%s4776_s7 + $0xb0] sm:$0xff] }
 0x2ac   : > { %1575 = vmatprep.subr.mxu0 %v2854_v13  ;;  %1691 = vmatprep.subr.mxu1 %v3396_v15  ;;  %v1679_v13 = vld [vmem:[%s4776_s7 + $0xa8] sm:$0xff] }
 0x2ad   : > { %1576 = vmatpush1.msra.mxu0 %v2853_v16  ;;  %1692 = vmatpush1.msra.mxu1 %v1672_v18  ;;  %v1678_v16 = vld [vmem:[%s4776_s7 + $0xa0] sm:$0xff]  ;;  %v1677_v18 = vld [vmem:[%s4776_s7 + $0x98] sm:$0xff] }
 0x2ae   : > { %1577 = vmatprep.subr.mxu0 %v2852_v17  ;;  %1693 = vmatprep.subr.mxu1 %v3396_v15  ;;  %v2885_v17 = vld [vmem:[%s4776_s7 + $0x160] sm:$0xff] }
 0x2af   : > { %1578 = vmatpush1.msra.mxu0 %v2851_v19  ;;  %1694 = vmatpush1.msra.mxu1 %v1671_v21  ;;  %v2884_v19 = vld [vmem:[%s4776_s7 + $0x158] sm:$0xff]  ;;  %v2883_v21 = vld [vmem:[%s4776_s7 + $0x150] sm:$0xff] }
 0x2b0   : > { %1579 = vmatprep.subr.mxu0 %v2850_v20  ;;  %1695 = vmatprep.subr.mxu1 %v3396_v15  ;;  %v1676_v20 = vld [vmem:[%s4776_s7 + $0x90] sm:$0xff] }
 0x2b1   : > { %1580 = vmatpush1.msra.mxu0 %v2849_v22  ;;  %1696 = vmatpush1.msra.mxu1 %v1670_v24  ;;  %v1675_v22 = vld [vmem:[%s4776_s7 + $0x88] sm:$0xff]  ;;  %v1674_v24 = vld [vmem:[%s4776_s7 + $0x80] sm:$0xff] }
 0x2b2   : > { %1581 = vmatprep.subr.mxu0 %v2848_v23  ;;  %1697 = vmatprep.subr.mxu1 %v3396_v15  ;;  %v2882_v23 = vld [vmem:[%s4776_s7 + $0x148] sm:$0xff] }
 0x2b3   : > { %1582 = vmatpush1.msra.mxu0 %v2847_v25  ;;  %1698 = vmatpush1.msra.mxu1 %v1669_v27  ;;  %v2881_v25 = vld [vmem:[%s4776_s7 + $0x140] sm:$0xff] }
 0x2b4   : > { %1583 = vmatprep.subr.mxu0 %v2846_v26  ;;  %1699 = vmatprep.subr.mxu1 %v3396_v15  ;;  %v1281_v27 = vld [vmem:[%s4775_s6] sm:$0x3] }
 0x2b5   : > { %1584 = vmatpush1.msra.mxu0 %v2845_v28  ;;  %1700 = vmatpush1.msra.mxu1 %v1668_v30 }
 0x2b6   : > { %1585 = vmatprep.subr.mxu0 %v2844_v29  ;;  %1701 = vmatprep.subr.mxu1 %v3396_v15  ;;  %v1399_v29 = vrot.slane %v1281_v27, %v563_v35 }
 0x2b7   : > { %1586 = vmatpush1.msra.mxu0 %v2843_v32  ;;  %1702 = vmatpush1.msra.mxu1 %v1667_v53  ;;  %v1403_v32 = vrot.slane %v1281_v27, %v567_v39  ;;  %v2900_v27 = vld [vmem:[%s4778_s9 + $0x78] sm:$0xff] }
 0x2b8   : > { %1587 = vmatprep.subr.mxu0 %v2842_v33  ;;  %1703 = vmatprep.subr.mxu1 %v3396_v15 }
 0x2b9   : > { %1588 = vmatpush1.msra.mxu0 %v2841_v34  ;;  %1704 = vmatpush1.msra.mxu1 %v1666_v55 }
 0x2ba   : > { %1589 = vmatprep.subr.mxu0 %v2840_v36  ;;  %1705 = vmatprep.subr.mxu1 %v3396_v15 }
 0x2bb   : > { %1590 = vmatpush1.msra.mxu0 %v2839_v37  ;;  %1706 = vmatpush1.msra.mxu1 %v1665_v57 }
 0x2bc   : > { %1591 = vmatprep.subr.mxu0 %v2838_v38  ;;  %1707 = vmatprep.subr.mxu1 %v3396_v15 }
 0x2bd   : > { %1592 = vmatpush1.msra.mxu0 %v2837_v40  ;;  %1708 = vmatpush1.msra.mxu1 %v1664_v59 }
 0x2be   : > { %1593 = vmatprep.subr.mxu0 %v2836_v41  ;;  %1709 = vmatprep.subr.mxu1 %v3396_v15 }
 0x2bf   : > { %1594 = vmatpush1.msra.mxu0 %v2835_v42  ;;  %1710 = vmatpush1.msra.mxu1 %v1663_v61  ;;  %v2908_v61 = vld [vmem:[%s4778_s9 + $0xb8] sm:$0xff] }
 0x2c0   : > { %1595 = vmatprep.subr.mxu0 %v2834_v43  ;;  %1711 = vmatprep.subr.mxu1 %v3396_v15 }
 0x2c1   : > { %1596 = vmatpush1.msra.mxu0 %v2833_v44  ;;  %1712 = vmatpush1.msra.mxu1 %v1662_v63  ;;  %v2906_v63 = vld [vmem:[%s4778_s9 + $0xa8] sm:$0xff] }
 0x2c2   : > { %2861 = vmatmul.mubr.msk.f32.vlgmr.msra.gmra.mxu0 %vm1277_vm14, %v1528_v46  ;;  %1789 = vmatprep.subr.mxu0 %v3396_v15 }
 0x2c3   : > { %1635 = vmatprep.mubr.f32.mxu0 %v3396_v15  ;;  %1790 = vmatpush1.msra.mxu0 %v2880_v45 }
 0x2c4   : > { %1791 = vmatprep.subr.mxu0 %v3396_v15  ;;  %1713 = vmatprep.subr.mxu1 %v3396_v15 }
 0x2c5   : > { %1792 = vmatpush1.msra.mxu0 %v2879_v47  ;;  %1714 = vmatpush1.msra.mxu1 %v1661_v1  ;;  %v2904_v1 = vld [vmem:[%s4778_s9 + $0x98] sm:$0xff] }
 0x2c6   : > { %2862 = vmatmul.mubr.msk.f32.gmra.mxu0 %vm1277_vm14, %v1529_v49  ;;  %1793 = vmatprep.subr.mxu0 %v3396_v15 }
 0x2c7   : > { %1794 = vmatpush1.msra.mxu0 %v2878_v48  ;;  %1715 = vmatprep.subr.mxu1 %v3396_v15 }
 0x2c8   : > { %1795 = vmatprep.subr.mxu0 %v3396_v15  ;;  %1716 = vmatpush1.msra.mxu1 %v1660_v3 }
 0x2c9   : > { %1796 = vmatpush1.msra.mxu0 %v2877_v50  ;;  %1717 = vmatprep.subr.mxu1 %v3396_v15 }
 0x2ca   : > { %1797 = vmatprep.subr.mxu0 %v3396_v15  ;;  %1718 = vmatpush1.msra.mxu1 %v1659_v5 }
 0x2cb   : > { %1798 = vmatpush1.msra.mxu0 %v2876_v51  ;;  %1719 = vmatprep.subr.mxu1 %v3396_v15 }
 0x2cc   : > { %1799 = vmatprep.subr.mxu0 %v3396_v15  ;;  %1720 = vmatpush1.msra.mxu1 %v1658_v7 }
 0x2cd   : > { %1800 = vmatpush1.msra.mxu0 %v2875_v52  ;;  %1737 = vmatprep.subr.mxu1 %v3396_v15 }
 0x2ce   : > { %1801 = vmatprep.subr.mxu0 %v3396_v15  ;;  %1738 = vmatpush2.msra.mxu1 %v1681_v9 }
 0x2cf   : > { %1802 = vmatpush1.msra.mxu0 %v2874_v54  ;;  %1739 = vmatprep.subr.mxu1 %v3396_v15 }
 0x2d0   : > { %1803 = vmatprep.subr.mxu0 %v3396_v15  ;;  %1740 = vmatpush2.msra.mxu1 %v1680_v11 }
 0x2d1   : > { %1804 = vmatpush1.msra.mxu0 %v2873_v56  ;;  %1741 = vmatprep.subr.mxu1 %v3396_v15 }
 0x2d2   : > { %1805 = vmatprep.subr.mxu0 %v3396_v15  ;;  %1742 = vmatpush2.msra.mxu1 %v1679_v13  ;;  %v2893_v13 = vld [vmem:[%s4777_s8 + $0x8] sm:$0x3f] }
 0x2d3   : > { %1806 = vmatpush1.msra.mxu0 %v2872_v58  ;;  %1743 = vmatprep.subr.mxu1 %v3396_v15 }
 0x2d4   : > { %1807 = vmatprep.subr.mxu0 %v3396_v15  ;;  %1744 = vmatpush2.msra.mxu1 %v1678_v16  ;;  %v2034_v16 = vld [vmem:[%s4778_s9 + $0x50] sm:$0xff] }
 0x2d5   : > { %1808 = vmatpush1.msra.mxu0 %v2871_v60  ;;  %1745 = vmatprep.subr.mxu1 %v3396_v15 }
 0x2d6   : > { %1809 = vmatprep.subr.mxu0 %v3396_v15  ;;  %1746 = vmatpush2.msra.mxu1 %v1677_v18  ;;  %v2032_v18 = vld [vmem:[%s4778_s9 + $0x40] sm:$0xff] }
 0x2d7   : > { %1810 = vmatpush1.msra.mxu0 %v2870_v62  ;;  %1747 = vmatprep.subr.mxu1 %v3396_v15  ;;  %v2907_v62 = vld [vmem:[%s4778_s9 + $0xb0] sm:$0xff] }
 0x2d8   : > { %1811 = vmatprep.subr.mxu0 %v3396_v15  ;;  %1748 = vmatpush2.msra.mxu1 %v1676_v20  ;;  %v2030_v20 = vld [vmem:[%s4778_s9 + $0x30] sm:$0xff] }
 0x2d9   : > { %1812 = vmatpush1.msra.mxu0 %v2869_v0  ;;  %1749 = vmatprep.subr.mxu1 %v3396_v15  ;;  %v2905_v0 = vld [vmem:[%s4778_s9 + $0xa0] sm:$0xff] }
 0x2da   : > { %1813 = vmatprep.subr.mxu0 %v3396_v15  ;;  %1750 = vmatpush2.msra.mxu1 %v1675_v22  ;;  %v2029_v22 = vld [vmem:[%s4778_s9 + $0x28] sm:$0xff] }
 0x2db   : > { %1814 = vmatpush1.msra.mxu0 %v2868_v2  ;;  %1751 = vmatprep.subr.mxu1 %v3396_v15 }
 0x2dc   : > { %1815 = vmatprep.subr.mxu0 %v3396_v15  ;;  %1752 = vmatpush2.msra.mxu1 %v1674_v24  ;;  %v2028_v24 = vld [vmem:[%s4778_s9 + $0x20] sm:$0xff] }
 0x2dd   : > { %1816 = vmatpush1.msra.mxu0 %v2867_v4  ;;  %3094 = vmatprep.subr.mxu1 %v3396_v15 }
 0x2de   : > { %1817 = vmatprep.subr.mxu0 %v3396_v15 }
 0x2df   : > { %1818 = vmatpush1.msra.mxu0 %v2866_v6 }
 0x2e0   : > { %1819 = vmatprep.subr.mxu0 %v3396_v15 }
 0x2e1   : > { %1820 = vmatpush1.msra.mxu0 %v2865_v8 }
 0x2e2   : > { %1837 = vmatprep.subr.mxu0 %v3396_v15 }
 0x2e3   : > { %1838 = vmatpush2.msra.mxu0 %v2888_v10 }
 0x2e4   : > { %1839 = vmatprep.subr.mxu0 %v3396_v15 }
 0x2e5   : > { %1840 = vmatpush2.msra.mxu0 %v2887_v12  ;;  %v1866_v12 = vld [vmem:[%s4777_s8] sm:$0x3f] }
 0x2e6   : > { %1841 = vmatprep.subr.mxu0 %v3396_v15 }
 0x2e7   : > { %1842 = vmatpush2.msra.mxu0 %v2886_v14  ;;  %v2035_v14 = vld [vmem:[%s4778_s9 + $0x58] sm:$0xff] }
 0x2e8   : > { %1843 = vmatprep.subr.mxu0 %v3396_v15 }
 0x2e9   : > { %1844 = vmatpush2.msra.mxu0 %v2885_v17  ;;  %v2033_v17 = vld [vmem:[%s4778_s9 + $0x48] sm:$0xff] }
 0x2ea   : > { %1845 = vmatprep.subr.mxu0 %v3396_v15 }
 0x2eb   : > { %1846 = vmatpush2.msra.mxu0 %v2884_v19  ;;  %v2031_v19 = vld [vmem:[%s4778_s9 + $0x38] sm:$0xff] }
 0x2ec   : > { %1847 = vmatprep.subr.mxu0 %v3396_v15 }
 0x2ed   : > { %1848 = vmatpush2.msra.mxu0 %v2883_v21  ;;  %v2903_v21 = vld [vmem:[%s4778_s9 + $0x90] sm:$0xff] }
 0x2ee   : > { %1849 = vmatprep.subr.mxu0 %v3396_v15 }
 0x2ef   : > { %1850 = vmatpush2.msra.mxu0 %v2882_v23  ;;  %v2902_v23 = vld [vmem:[%s4778_s9 + $0x88] sm:$0xff] }
 0x2f0   : > { %1851 = vmatprep.subr.mxu0 %v3396_v15 }
 0x2f1   : > { %1852 = vmatpush2.msra.mxu0 %v2881_v25  ;;  %v2901_v25 = vld [vmem:[%s4778_s9 + $0x80] sm:$0xff] }
 0x2f2   : > { %3135 = vmatprep.subr.mxu0 %v3396_v15 }
 0x365   : > { %v1384_v26 = vpop.f32.mrf.mxu0 }
 0x366   : > { %v1513_v30 = vpop.f32.mrf.mxu1  ;;  %v1406_v34 = vadd.f32 %v1399_v29, %v1384_v26  ;;  %v2027_v26 = vld [vmem:[%s4778_s9 + $0x18] sm:$0xff] }
 0x367   : > { %v1386_v28 = vpop.f32.mrf.mxu0 }
 0x368   : > { %v1515_v36 = vpop.f32.mrf.mxu1  ;;  %v1407_v37 = vadd.f32 %v1403_v32, %v1386_v28  ;;  %v1524_v40 = vadd.f32 %v1513_v30, %v1406_v34  ;;  %v2026_v28 = vld [vmem:[%s4778_s9 + $0x10] sm:$0xff]  ;;  %v2025_v30 = vld [vmem:[%s4778_s9 + $0x8] sm:$0xff]  ;;  %v2897_v34 = vld [vmem:[%s4778_s9 + $0x60] sm:$0xff] }
 0x36a   : > { %v1390_v33 = vpop.f32.mrf.mxu0  ;;  %v1519_v42 = vpop.f32.mrf.mxu1  ;;  %v1525_v45 = vadd.f32 %v1515_v36, %v1407_v37 }
 0x36b   : > { %v1408_v41 = vadd.f32 %v1399_v29, %v1390_v33  ;;  %v2899_v29 = vld [vmem:[%s4778_s9 + $0x70] sm:$0xff]  ;;  %v2024_v33 = vld [vmem:[%s4778_s9] sm:$0xff] }
 0x36c   : > { %v1392_v38 = vpop.f32.mrf.mxu0  ;;  %v1521_v49 = vpop.f32.mrf.mxu1 }
 0x36d   : > { %v1409_v43 = vadd.f32 %v1403_v32, %v1392_v38  ;;  %v1526_v48 = vadd.f32 %v1519_v42, %v1408_v41  ;;  %v2898_v32 = vld [vmem:[%s4778_s9 + $0x68] sm:$0xff]  ;;  %v2921_v42 = vld [vmem:[%s4778_s9 + $0x118] sm:$0xff] }
 0x36f   : > { %v1527_v50 = vadd.f32 %v1521_v49, %v1409_v43  ;;  %v2934_v43 = vld [vmem:[%s4778_s9 + $0x178] sm:$0xff]  ;;  %v2932_v49 = vld [vmem:[%s4778_s9 + $0x168] sm:$0xff] }
 0x382   : > { %v1631_v44 = vpop.f32.mrf.mxu0 }
 0x383   : > { %v1642_v46 = vadd.f32 %v1631_v44, %v1524_v40 }
 0x384   : > { %v1633_v47 = vpop.f32.mrf.mxu0 }
 0x385   : > { %v1643_v35 = vadd.f32 %v1633_v47, %v1525_v45  ;;  %v1650_v51 = vmul.f32 0.33, %v1642_v46  ;;  %vm1646_vm0 = vcmp.gt.f32.partialorder %v1642_v46, 0.0  ;;  %v2933_v47 = vld [vmem:[%s4778_s9 + $0x170] sm:$0xff] }
 0x386   : > { %v1637_v31 = vpop.f32.mrf.mxu0 }
 0x387   : > { %vm1647_vm1 = vcmp.gt.f32.partialorder %v1643_v35, 0.0  ;;  %v1651_v39 = vmul.f32 0.33, %v1643_v35  ;;  %v1644_v52 = vadd.f32 %v1637_v31, %v1526_v48  ;;  %v1654_v56 = vsel %vm1646_vm0, %v1642_v46, %v1650_v51  ;;  %v2920_v46 = vld [vmem:[%s4778_s9 + $0x110] sm:$0xff]  ;;  %v2919_v48 = vld [vmem:[%s4778_s9 + $0x108] sm:$0xff]  ;;  %v2917_v51 = vld [vmem:[%s4778_s9 + $0xf8] sm:$0xff] }
 0x388   : > { %v1639_v53 = vpop.f32.mrf.mxu0  ;;  %v2930_v31 = vld [vmem:[%s4778_s9 + $0x158] sm:$0xff] }
 0x389   : > { %v1645_v54 = vadd.f32 %v1639_v53, %v1527_v50  ;;  %v1655_v55 = vsel %vm1647_vm1, %v1643_v35, %v1651_v39  ;;  %v1652_v57 = vmul.f32 0.33, %v1644_v52  ;;  %vm1648_vm4 = vcmp.gt.f32.partialorder %v1644_v52, 0.0  ;;  %v2918_v35 = vld [vmem:[%s4778_s9 + $0x100] sm:$0xff]  ;;  %v2916_v39 = vld [vmem:[%s4778_s9 + $0xf0] sm:$0xff]  ;;  %v2915_v53 = vld [vmem:[%s4778_s9 + $0xe8] sm:$0xff] }
 0x38a   : > { %2863 = vmatprep.mubr.msk.f32.mxu1 %vm1682_vm15, %v1655_v55  ;;  %2889 = vmatprep.mubr.msk.f32.mxu0 %vm1682_vm15, %v1655_v55  ;;  %v2931_v50 = vld [vmem:[%s4778_s9 + $0x160] sm:$0xff] }
 0x38b   : > { %vm1649_vm3 = vcmp.gt.f32.partialorder %v1645_v54, 0.0  ;;  %v1653_v58 = vmul.f32 0.33, %v1645_v54  ;;  %1754 = vmatmul.mubr.f32.vlgmr.msra.gmra.mxu1 %v1654_v56  ;;  %1854 = vmatmul.mubr.f32.vlgmr.msra.gmra.mxu0 %v1654_v56  ;;  %v1656_v60 = vsel %vm1648_vm4, %v1644_v52, %v1652_v57  ;;  %v2929_v52 = vld [vmem:[%s4778_s9 + $0x150] sm:$0xff]  ;;  %v2914_v55 = vld [vmem:[%s4778_s9 + $0xe0] sm:$0xff]  ;;  %v2913_v57 = vld [vmem:[%s4778_s9 + $0xd8] sm:$0xff] }
 0x38c   : > { %3136 = vmatpush3.msra.mxu0 %v2908_v61  ;;  %v2927_v56 = vld [vmem:[%s4778_s9 + $0x140] sm:$0xff]  ;;  %v2911_v61 = vld [vmem:[%s4778_s9 + $0xc8] sm:$0xff] }
 0x38d   : > { %v1657_v59 = vsel %vm1649_vm3, %v1645_v54, %v1653_v58  ;;  %3137 = vmatprep.subr.mxu0 %v3396_v15  ;;  %v2928_v54 = vld [vmem:[%s4778_s9 + $0x148] sm:$0xff]  ;;  %v2926_v58 = vld [vmem:[%s4778_s9 + $0x138] sm:$0xff] }
 0x38e   : > { %2864 = vmatprep.mubr.msk.f32.mxu1 %vm1682_vm15, %v1657_v59  ;;  %2890 = vmatprep.mubr.msk.f32.mxu0 %vm1682_vm15, %v1657_v59  ;;  %v2912_v59 = vld [vmem:[%s4778_s9 + $0xd0] sm:$0xff] }
 0x38f   : > { %1759 = vmatmul.mubr.f32.gmra.mxu1 %v1656_v60  ;;  %1859 = vmatmul.mubr.f32.gmra.mxu0 %v1656_v60  ;;  %v2925_v60 = vld [vmem:[%s4778_s9 + $0x130] sm:$0xff] }
 0x390   : > { %3098 = vmatprep.mubr.msk.f32.mxu1 %vm3397_vm5, %v3396_v15  ;;  %3159 = vmatprep.mubr.msk.f32.mxu0 %vm3397_vm5, %v3396_v15 }
 0x391   : > { %3138 = vmatpush3.msra.mxu0 %v2907_v62  ;;  %v2924_v62 = vld [vmem:[%s4778_s9 + $0x128] sm:$0xff] }
 0x392   : > { %3139 = vmatprep.subr.mxu0 %v3396_v15 }
 0x393   : > { %3140 = vmatpush3.msra.mxu0 %v2906_v63  ;;  %v2910_v63 = vld [vmem:[%s4778_s9 + $0xc0] sm:$0xff] }
 0x394   : > { %3141 = vmatprep.subr.mxu0 %v3396_v15 }
 0x395   : > { %3142 = vmatpush3.msra.mxu0 %v2905_v0  ;;  %v2923_v0 = vld [vmem:[%s4778_s9 + $0x120] sm:$0xff] }
 0x396   : > { %3143 = vmatprep.subr.mxu0 %v3396_v15 }
 0x397   : > { %3144 = vmatpush3.msra.mxu0 %v2904_v1  ;;  %v2947_v1 = vld [vmem:[%s4778_s9 + $0x1d8] sm:$0xff] }
 0x398   : > { %3145 = vmatprep.subr.mxu0 %v3396_v15 }
 0x399   : > { %3146 = vmatpush3.msra.mxu0 %v2903_v21  ;;  %v2952_v21 = vld [vmem:[%s4778_s9 + $0x1f8] sm:$0xff] }
 0x39a   : > { %3147 = vmatprep.subr.mxu0 %v3396_v15 }
 0x39b   : > { %3148 = vmatpush3.msra.mxu0 %v2902_v23  ;;  %v2951_v23 = vld [vmem:[%s4778_s9 + $0x1f0] sm:$0xff] }
 0x39c   : > { %3149 = vmatprep.subr.mxu0 %v3396_v15 }
 0x39d   : > { %3150 = vmatpush3.msra.mxu0 %v2901_v25  ;;  %v2950_v25 = vld [vmem:[%s4778_s9 + $0x1e8] sm:$0xff] }
 0x39e   : > { %3151 = vmatprep.subr.mxu0 %v3396_v15 }
 0x39f   : > { %3152 = vmatpush3.msra.mxu0 %v2900_v27  ;;  %v2949_v27 = vld [vmem:[%s4778_s9 + $0x1e0] sm:$0xff] }
 0x3a0   : > { %3153 = vmatprep.subr.mxu0 %v3396_v15 }
 0x3a1   : > { %3154 = vmatpush3.msra.mxu0 %v2899_v29 }
 0x3a2   : > { %3155 = vmatprep.subr.mxu0 %v3396_v15 }
 0x3a3   : > { %3156 = vmatpush3.msra.mxu0 %v2898_v32  ;;  %v2559_v32 = vld [vmem:[%s4780_s11 + $0x30] sm:$0xff] }
 0x3a4   : > { %3157 = vmatprep.subr.mxu0 %v3396_v15 }
 0x3a5   : > { %3158 = vmatpush3.msra.mxu0 %v2897_v34  ;;  %v2557_v34 = vld [vmem:[%s4780_s11 + $0x20] sm:$0xff] }
 0x3a6   : > { %3189 = vmatprep.subr.mxu0 %v3396_v15 }
 0x44b   : > { %v1755_v2 = vpop.f32.mrf.mxu1  ;;  %v1855_v3 = vpop.f32.mrf.mxu0 }
 0x44c   : > { %v1864_v11 = vmax.f32 %v1755_v2, %v1855_v3 }
 0x44d   : > { %v1757_v4 = vpop.f32.mrf.mxu1  ;;  %v1857_v5 = vpop.f32.mrf.mxu0 }
 0x44e   : > { %v2960_v4 = vld [vmem:[%s4778_s9 + $0x238] sm:$0xff]  ;;  %v2946_v5 = vld [vmem:[%s4778_s9 + $0x1d0] sm:$0xff] }
 0x44f   : > { %v1760_v6 = vpop.f32.mrf.mxu1  ;;  %v1860_v7 = vpop.f32.mrf.mxu0 }
 0x450   : > { %v1865_v8 = vmax.f32 %v1760_v6, %v1860_v7  ;;  %v2959_v6 = vld [vmem:[%s4778_s9 + $0x230] sm:$0xff]  ;;  %v2945_v7 = vld [vmem:[%s4778_s9 + $0x1c8] sm:$0xff] }
 0x451   : > { %v1762_v9 = vpop.f32.mrf.mxu1  ;;  %v1862_v10 = vpop.f32.mrf.mxu0 }
 0x452   : > { %3095 = vmatpush3.msk.msra.mxu1 %vm1112_vm12, %v1865_v8  ;;  %v2944_v9 = vld [vmem:[%s4778_s9 + $0x1c0] sm:$0xff] }
 0x453   : > { %3096 = vmatprep.subr.mxu1 %v3396_v15  ;;  %v2957_v10 = vld [vmem:[%s4778_s9 + $0x220] sm:$0xff] }
 0x454   : > { %3097 = vmatpush3.msra.mxu1 %v1864_v11 }
 0x455   : > { %3099 = vmatmul.mubr.msk.f32.vlgmr.msra.gmra.mxu1 %vm1867_vm6, %v1866_v12  ;;  %3101 = vmatprep.subr.mxu1 %v3396_v15  ;;  %v2956_v12 = vld [vmem:[%s4778_s9 + $0x218] sm:$0xff] }
 0x456   : > { %3102 = vmatpush3.msk.msra.mxu1 %vm1112_vm12, %v1865_v8  ;;  %3105 = vmatprep.mubr.msk.f32.mxu1 %vm3397_vm5, %v3396_v15  ;;  %v2958_v8 = vld [vmem:[%s4778_s9 + $0x228] sm:$0xff] }
 0x457   : > { %3103 = vmatprep.subr.mxu1 %v3396_v15 }
 0x458   : > { %3104 = vmatpush3.msra.mxu1 %v1864_v11  ;;  %v2943_v11 = vld [vmem:[%s4778_s9 + $0x1b8] sm:$0xff] }
 0x459   : > { %3106 = vmatmul.mubr.msk.f32.vlgmr.msra.gmra.mxu1 %vm1867_vm6, %v2893_v13  ;;  %3108 = vmatprep.subr.mxu1 %v3396_v15  ;;  %v2942_v13 = vld [vmem:[%s4778_s9 + $0x1b0] sm:$0xff] }
 0x45a   : > { %3109 = vmatpush3.msra.mxu1 %v2035_v14  ;;  %3132 = vmatprep.mubr.msk.f32.mxu1 %vm3397_vm5, %v3396_v15  ;;  %v2955_v14 = vld [vmem:[%s4778_s9 + $0x210] sm:$0xff] }
 0x45b   : > { %3110 = vmatprep.subr.mxu1 %v3396_v15 }
 0x45c   : > { %3111 = vmatpush3.msra.mxu1 %v2034_v16  ;;  %v2941_v16 = vld [vmem:[%s4778_s9 + $0x1a8] sm:$0xff] }
 0x45d   : > { %3112 = vmatprep.subr.mxu1 %v3396_v15 }
 0x45e   : > { %3113 = vmatpush3.msra.mxu1 %v2033_v17  ;;  %v2954_v17 = vld [vmem:[%s4778_s9 + $0x208] sm:$0xff] }
 0x45f   : > { %3114 = vmatprep.subr.mxu1 %v3396_v15 }
 0x460   : > { %3115 = vmatpush3.msra.mxu1 %v2032_v18  ;;  %v2940_v18 = vld [vmem:[%s4778_s9 + $0x1a0] sm:$0xff] }
 0x461   : > { %3116 = vmatprep.subr.mxu1 %v3396_v15 }
 0x462   : > { %3117 = vmatpush3.msra.mxu1 %v2031_v19  ;;  %v2953_v19 = vld [vmem:[%s4778_s9 + $0x200] sm:$0xff] }
 0x463   : > { %3118 = vmatprep.subr.mxu1 %v3396_v15 }
 0x464   : > { %3119 = vmatpush3.msra.mxu1 %v2030_v20  ;;  %v2939_v20 = vld [vmem:[%s4778_s9 + $0x198] sm:$0xff] }
 0x465   : > { %3120 = vmatprep.subr.mxu1 %v3396_v15 }
 0x466   : > { %3121 = vmatpush3.msra.mxu1 %v2029_v22  ;;  %v2938_v22 = vld [vmem:[%s4778_s9 + $0x190] sm:$0xff] }
 0x467   : > { %3122 = vmatprep.subr.mxu1 %v3396_v15 }
 0x468   : > { %3123 = vmatpush3.msra.mxu1 %v2028_v24  ;;  %v2937_v24 = vld [vmem:[%s4778_s9 + $0x188] sm:$0xff] }
 0x469   : > { %3124 = vmatprep.subr.mxu1 %v3396_v15 }
 0x46a   : > { %3125 = vmatpush3.msra.mxu1 %v2027_v26  ;;  %v2936_v26 = vld [vmem:[%s4778_s9 + $0x180] sm:$0xff] }
 0x46b   : > { %3126 = vmatprep.subr.mxu1 %v3396_v15 }
 0x46c   : > { %3127 = vmatpush3.msra.mxu1 %v2026_v28 }
 0x46d   : > { %3128 = vmatprep.subr.mxu1 %v3396_v15 }
 0x46e   : > { %3129 = vmatpush3.msra.mxu1 %v2025_v30  ;;  %v2560_v30 = vld [vmem:[%s4780_s11 + $0x38] sm:$0xff] }
 0x46f   : > { %3130 = vmatprep.subr.mxu1 %v3396_v15 }
 0x470   : > { %3131 = vmatpush3.msra.mxu1 %v2024_v33  ;;  %v2558_v33 = vld [vmem:[%s4780_s11 + $0x28] sm:$0xff] }
 0x471   : > { %3162 = vmatprep.subr.mxu1 %v3396_v15 }
 0x515   : > { %v1940_v36 = vpop.f32.mrf.mxu1 }
 0x517   : > { %v3100_v37 = vpop.f32.mrf.mxu1 }
 0x518   : > { %v2555_v37 = vld [vmem:[%s4780_s11 + $0x10] sm:$0xff] }
 0x519   : > { %v2015_v38 = vpop.f32.mrf.mxu1 }
 0x51a   : > { %v2019_v40 = vmax.f32 %v1940_v36, %v2015_v38  ;;  %v2556_v36 = vld [vmem:[%s4780_s11 + $0x18] sm:$0xff]  ;;  %v2554_v38 = vld [vmem:[%s4780_s11 + $0x8] sm:$0xff] }
 0x51b   : > { %v3107_v41 = vpop.f32.mrf.mxu1 }
 0x51c   : > { %2021 = vst.msk [vmem:[#allocation3] sm:$0x3f] %vm2020_vm7, %v2019_v40  ;;  %v2553_v40 = vld [vmem:[%s4780_s11] sm:$0xff] }
 0x523   : > { %v2023_v44 = vld [vmem:[#allocation3] sm:$0x1]  ;;  %v2110_v45 = vld [vmem:[#allocation3 + $0x1] sm:$0x1]  ;;  %v2198_v2 = vld [vmem:[#allocation3 + $0x2] sm:$0x1] }
 0x524   : > { %3133 = vmatmul.mubr.msk.f32.vlgmr.msra.gmra.mxu1 %vm887_vm2, %v2023_v44  ;;  %3160 = vmatmul.mubr.msk.f32.vlgmr.msra.gmra.mxu0 %vm887_vm2, %v2110_v45  ;;  %v2286_v3 = vld [vmem:[#allocation3 + $0x3] sm:$0x1]  ;;  %v2374_v28 = vld [vmem:[#allocation3 + $0x4] sm:$0x1]  ;;  %v2462_v29 = vld [vmem:[#allocation3 + $0x5] sm:$0x1] }
 0x525   : > { %3163 = vmatpush3.msra.mxu1 %v2921_v42  ;;  %3190 = vmatpush3.msra.mxu0 %v2934_v43 }
 0x526   : > { %3164 = vmatprep.subr.mxu1 %v3396_v15  ;;  %3191 = vmatprep.subr.mxu0 %v3396_v15 }
 0x527   : > { %3165 = vmatpush3.msra.mxu1 %v2920_v46  ;;  %3192 = vmatpush3.msra.mxu0 %v2933_v47 }
 0x528   : > { %3166 = vmatprep.subr.mxu1 %v3396_v15  ;;  %3193 = vmatprep.subr.mxu0 %v3396_v15 }
 0x529   : > { %3167 = vmatpush3.msra.mxu1 %v2919_v48  ;;  %3194 = vmatpush3.msra.mxu0 %v2932_v49  ;;  %v2022_v49 = vld [vmem:[%s4779_s10] sm:$0x1] }
 0x52a   : > { %3168 = vmatprep.subr.mxu1 %v3396_v15  ;;  %3195 = vmatprep.subr.mxu0 %v3396_v15 }
 0x52b   : > { %3169 = vmatpush3.msra.mxu1 %v2918_v35  ;;  %3196 = vmatpush3.msra.mxu0 %v2931_v50 }
 0x52c   : > { %3170 = vmatprep.subr.mxu1 %v3396_v15  ;;  %3197 = vmatprep.subr.mxu0 %v3396_v15 }
 0x52d   : > { %3171 = vmatpush3.msra.mxu1 %v2917_v51  ;;  %3198 = vmatpush3.msra.mxu0 %v2930_v31 }
 0x52e   : > { %3172 = vmatprep.subr.mxu1 %v3396_v15  ;;  %3199 = vmatprep.subr.mxu0 %v3396_v15 }
 0x52f   : > { %3173 = vmatpush3.msra.mxu1 %v2916_v39  ;;  %3200 = vmatpush3.msra.mxu0 %v2929_v52 }
 0x530   : > { %3174 = vmatprep.subr.mxu1 %v3396_v15  ;;  %3201 = vmatprep.subr.mxu0 %v3396_v15 }
 0x531   : > { %3175 = vmatpush3.msra.mxu1 %v2915_v53  ;;  %3202 = vmatpush3.msra.mxu0 %v2928_v54 }
 0x532   : > { %3176 = vmatprep.subr.mxu1 %v3396_v15  ;;  %3203 = vmatprep.subr.mxu0 %v3396_v15 }
 0x533   : > { %3177 = vmatpush3.msra.mxu1 %v2914_v55  ;;  %3204 = vmatpush3.msra.mxu0 %v2927_v56 }
 0x534   : > { %3178 = vmatprep.subr.mxu1 %v3396_v15  ;;  %3205 = vmatprep.subr.mxu0 %v3396_v15 }
 0x535   : > { %3179 = vmatpush3.msra.mxu1 %v2913_v57  ;;  %3206 = vmatpush3.msra.mxu0 %v2926_v58  ;;  %v2561_v58 = vld [vmem:[%s4781_s12] sm:$0x1] }
 0x536   : > { %3180 = vmatprep.subr.mxu1 %v3396_v15  ;;  %3207 = vmatprep.subr.mxu0 %v3396_v15 }
 0x537   : > { %3181 = vmatpush3.msra.mxu1 %v2912_v59  ;;  %3208 = vmatpush3.msra.mxu0 %v2925_v60 }
 0x538   : > { %3182 = vmatprep.subr.mxu1 %v3396_v15  ;;  %3209 = vmatprep.subr.mxu0 %v3396_v15 }
 0x539   : > { %3183 = vmatpush3.msra.mxu1 %v2911_v61  ;;  %3210 = vmatpush3.msra.mxu0 %v2924_v62 }
 0x53a   : > { %3184 = vmatprep.subr.mxu1 %v3396_v15  ;;  %3211 = vmatprep.subr.mxu0 %v3396_v15 }
 0x53b   : > { %3185 = vmatpush3.msra.mxu1 %v2910_v63  ;;  %3186 = vmatprep.mubr.msk.f32.mxu1 %vm3397_vm5, %v3396_v15 }
 0x53c   : > { %3212 = vmatpush3.msra.mxu0 %v2923_v0  ;;  %3213 = vmatprep.mubr.msk.f32.mxu0 %vm3397_vm5, %v3396_v15 }
 0x53d   : > { %3187 = vmatmul.mubr.msk.f32.vlgmr.msra.gmra.mxu1 %vm887_vm2, %v2198_v2  ;;  %3214 = vmatmul.mubr.msk.f32.vlgmr.msra.gmra.mxu0 %vm887_vm2, %v2286_v3 }
 0x53e   : > { %3216 = vmatprep.subr.mxu1 %v3396_v15  ;;  %3243 = vmatprep.subr.mxu0 %v3396_v15 }
 0x53f   : > { %3217 = vmatpush3.msra.mxu1 %v2947_v1  ;;  %3244 = vmatpush3.msra.mxu0 %v2960_v4 }
 0x540   : > { %3218 = vmatprep.subr.mxu1 %v3396_v15  ;;  %3245 = vmatprep.subr.mxu0 %v3396_v15 }
 0x541   : > { %3219 = vmatpush3.msra.mxu1 %v2946_v5  ;;  %3246 = vmatpush3.msra.mxu0 %v2959_v6 }
 0x542   : > { %3220 = vmatprep.subr.mxu1 %v3396_v15  ;;  %3247 = vmatprep.subr.mxu0 %v3396_v15 }
 0x543   : > { %3221 = vmatpush3.msra.mxu1 %v2945_v7  ;;  %3248 = vmatpush3.msra.mxu0 %v2958_v8 }
 0x544   : > { %3222 = vmatprep.subr.mxu1 %v3396_v15  ;;  %3249 = vmatprep.subr.mxu0 %v3396_v15 }
 0x545   : > { %3223 = vmatpush3.msra.mxu1 %v2944_v9  ;;  %3250 = vmatpush3.msra.mxu0 %v2957_v10 }
 0x546   : > { %3224 = vmatprep.subr.mxu1 %v3396_v15  ;;  %3251 = vmatprep.subr.mxu0 %v3396_v15 }
 0x547   : > { %3225 = vmatpush3.msra.mxu1 %v2943_v11  ;;  %3252 = vmatpush3.msra.mxu0 %v2956_v12 }
 0x548   : > { %3226 = vmatprep.subr.mxu1 %v3396_v15  ;;  %3253 = vmatprep.subr.mxu0 %v3396_v15 }
 0x549   : > { %3227 = vmatpush3.msra.mxu1 %v2942_v13  ;;  %3254 = vmatpush3.msra.mxu0 %v2955_v14 }
 0x54a   : > { %3228 = vmatprep.subr.mxu1 %v3396_v15  ;;  %3255 = vmatprep.subr.mxu0 %v3396_v15 }
 0x54b   : > { %3229 = vmatpush3.msra.mxu1 %v2941_v16  ;;  %3256 = vmatpush3.msra.mxu0 %v2954_v17 }
 0x54c   : > { %3230 = vmatprep.subr.mxu1 %v3396_v15  ;;  %3257 = vmatprep.subr.mxu0 %v3396_v15 }
 0x54d   : > { %3231 = vmatpush3.msra.mxu1 %v2940_v18  ;;  %3258 = vmatpush3.msra.mxu0 %v2953_v19 }
 0x54e   : > { %3232 = vmatprep.subr.mxu1 %v3396_v15  ;;  %3259 = vmatprep.subr.mxu0 %v3396_v15 }
 0x54f   : > { %3233 = vmatpush3.msra.mxu1 %v2939_v20  ;;  %3260 = vmatpush3.msra.mxu0 %v2952_v21 }
 0x550   : > { %3234 = vmatprep.subr.mxu1 %v3396_v15  ;;  %3261 = vmatprep.subr.mxu0 %v3396_v15 }
 0x551   : > { %3235 = vmatpush3.msra.mxu1 %v2938_v22  ;;  %3262 = vmatpush3.msra.mxu0 %v2951_v23 }
 0x552   : > { %3236 = vmatprep.subr.mxu1 %v3396_v15  ;;  %3263 = vmatprep.subr.mxu0 %v3396_v15 }
 0x553   : > { %3237 = vmatpush3.msra.mxu1 %v2937_v24  ;;  %3264 = vmatpush3.msra.mxu0 %v2950_v25 }
 0x554   : > { %3238 = vmatprep.subr.mxu1 %v3396_v15  ;;  %3265 = vmatprep.subr.mxu0 %v3396_v15 }
 0x555   : > { %3239 = vmatpush3.msra.mxu1 %v2936_v26  ;;  %3240 = vmatprep.mubr.msk.f32.mxu1 %vm3397_vm5, %v3396_v15 }
 0x556   : > { %3266 = vmatpush3.msra.mxu0 %v2949_v27  ;;  %3267 = vmatprep.mubr.msk.f32.mxu0 %vm3397_vm5, %v3396_v15 }
 0x557   : > { %3241 = vmatmul.mubr.msk.f32.vlgmr.msra.gmra.mxu1 %vm887_vm2, %v2374_v28  ;;  %3268 = vmatmul.mubr.msk.f32.vlgmr.msra.gmra.mxu0 %vm887_vm2, %v2462_v29 }
 0x558   : > { %3270 = vmatprep.subr.mxu1 %v3396_v15  ;;  %3286 = vmatprep.mubr.msk.f32.mxu1 %vm3397_vm5, %v3396_v15 }
 0x559   : > { %3271 = vmatpush3.msra.mxu1 %v2560_v30 }
 0x55a   : > { %3272 = vmatprep.subr.mxu1 %v3396_v15 }
 0x55b   : > { %3273 = vmatpush3.msra.mxu1 %v2559_v32 }
 0x55c   : > { %3274 = vmatprep.subr.mxu1 %v3396_v15 }
 0x55d   : > { %3275 = vmatpush3.msra.mxu1 %v2558_v33 }
 0x55e   : > { %3276 = vmatprep.subr.mxu1 %v3396_v15 }
 0x55f   : > { %3277 = vmatpush3.msra.mxu1 %v2557_v34 }
 0x560   : > { %3278 = vmatprep.subr.mxu1 %v3396_v15 }
 0x561   : > { %3279 = vmatpush3.msra.mxu1 %v2556_v36 }
 0x562   : > { %3280 = vmatprep.subr.mxu1 %v3396_v15 }
 0x563   : > { %3281 = vmatpush3.msra.mxu1 %v2555_v37 }
 0x564   : > { %3282 = vmatprep.subr.mxu1 %v3396_v15 }
 0x565   : > { %3283 = vmatpush3.msra.mxu1 %v2554_v38 }
 0x566   : > { %3284 = vmatprep.subr.mxu1 %v3396_v15 }
 0x567   : > { %3285 = vmatpush3.msra.mxu1 %v2553_v40 }
 0x5e4   : > { %v2105_v41 = vpop.f32.mrf.mxu1  ;;  %v2193_v42 = vpop.f32.mrf.mxu0 }
 0x5e5   : > { %v2109_v35 = vadd.f32 %v2105_v41, %v2022_v49 }
 0x5e6   : > { %v3134_v43 = vpop.f32.mrf.mxu1  ;;  %v3161_v44 = vpop.f32.mrf.mxu0 }
 0x5e7   : > { %v2197_v50 = vadd.f32 %v2193_v42, %v2109_v35 }
 0x5fd   : > { %v2281_v45 = vpop.f32.mrf.mxu1  ;;  %v2369_v46 = vpop.f32.mrf.mxu0 }
 0x5fe   : > { %v2285_v15 = vadd.f32 %v2281_v45, %v2197_v50 }
 0x5ff   : > { %v3188_v47 = vpop.f32.mrf.mxu1  ;;  %v3215_v48 = vpop.f32.mrf.mxu0 }
 0x600   : > { %v2373_v51 = vadd.f32 %v2369_v46, %v2285_v15 }
 0x617   : > { %v2457_v31 = vpop.f32.mrf.mxu1  ;;  %v2545_v39 = vpop.f32.mrf.mxu0 }
 0x618   : > { %v2461_v52 = vadd.f32 %v2457_v31, %v2373_v51 }
 0x619   : > { %v3242_v53 = vpop.f32.mrf.mxu1  ;;  %v3269_v54 = vpop.f32.mrf.mxu0 }
 0x61a   : > { %v2549_v55 = vadd.f32 %v2545_v39, %v2461_v52 }
 0x61c   : > { %vm2550_vm2 = vcmp.gt.f32.partialorder %v2549_v55, 0.0  ;;  %v2551_v56 = vmul.f32 0.33, %v2549_v55 }
 0x61e   : > { %v2552_v57 = vsel %vm2550_vm2, %v2549_v55, %v2551_v56 }
 0x61f   : > { %3287 = vmatmul.mubr.msk.f32.vlgmr.msra.gmra.mxu1 %vm1682_vm15, %v2552_v57 }
 0x6df   : > { %v2631_v59 = vpop.f32.mrf.mxu1 }
 0x6e0   : > { %v2632_v60 = vadd.f32 %v2631_v59, %v2561_v58 }
 0x6e1   : > { %v3288_v61 = vpop.f32.mrf.mxu1 }
 0x6e2   : > { %v2636_v62 = vsel %vm2635_vm8, %v2632_v60, -inf }
 0x6e3   : > { %2637 = vmax.xlane.f32.xlu0 %v2636_v62 }
 0x76c   : > { %v2638_v63 = vpop.xlane.xlu0 %2637 }
 0x76d   : > { %v2639_v0 = vsub.f32 %v2632_v60, %v2638_v63 }
 0x76f   : > { %v2640_v1 = vmul.f32 1.442695, %v2639_v0 }
 0x771   : > { %3330 = vpow2.f32 %v2640_v1 }
 0x77e   : > { %v3331_v2 = vpop.eup %3330 }
 0x77f   : > { %v2642_v3 = vsel %vm2635_vm8, %v3331_v2, 0.0 }
 0x780   : > { %2643 = vadd.xlane.f32.xlu0 %v2642_v3 }
 0x809   : > { %v2644_v4 = vpop.xlane.xlu0 %2643 }
 0x80a   : > { %3332 = vlog2.f32 %v2644_v4 }
 0x817   : > { %v3333_v5 = vpop.eup %3332 }
 0x818   : > { %v2646_v6 = vmul.f32 0.6931472, %v3333_v5 }
 0x81a   : > { %v2647_v7 = vsub.f32 %v2639_v0, %v2646_v6 }
 0x81c   : > { %2648 = vst.msk [vmem:[%s432_s27] sm:$0x1] %vm2635_vm8, %v2647_v7 }
 0x81d   : > { %3347 = shalt.err (!%p3344_p3)
}
 0x81e   : > { %s3348_s24 = scalar_lea.hbm %s2660_s16, 16  ;;  %s3352_s27 = scalar_lea.hbm %s4782_s13, 32 }
 0x81f   : > { %p3349_p4 = scmp.ne.s32.totalorder %s2660_s16, %s3348_s24  ;;  %p3353_p9 = scmp.lt.s32.totalorder %s2660_s16, %s4782_s13 }
 0x820   : > { %p3354_p10 = scmp.lt.s32.totalorder %s3352_s27, %s3348_s24 }
 0x821   : > { %p3350_p7 = pnand %p3349_p4, %p3507_p5 }
 0x822   : > { %p3355_p11 = por %p3354_p10, %p3353_p9 }
 0x823   : > { %p3351_p8 = pneg %p3350_p7 }
 0x825   : > { %p3356_p12 = pnand %p3355_p11, %p3351_p8 }
 0x827   : > { %3359 = shalt.err (!%p3356_p12)
}
 0x828   : > { %3289 = dma.vmem_to_hbm [thread:$0]  (%p3507_p5), %s2663_s17, 16, %s2660_s16, %s2650_s20  }
 0x829 PF: > { %p3295_p13 = scmp.ge.s32.totalorder %s3394_s28, 2  ;;  %s2674_s0 = sand.u32 1, %s3382_s25  }
 0x82a   : > { %s2675_s21 = scalar_lea.sflag [#allocation5], %s2674_s0 }
 0x82b   : > { %p3292_p0 = pnand %p3295_p13, %p3511_p6 }
 0x82d   : > { %p3293_p1 = pneg %p3292_p0 }
 0x82f   : > { %3377 = dma.done.wait (%p3293_p1), %s2675_s21, 16  }
 0x830   : > { %3379 = vsyncadd (%p3293_p1), %s2675_s21, 4294967280  ;;  %s4792_s1 = sld [smem:[#allocation7_spill]]  ;;  %p23_p2 = scmp.ge.s32.totalorder %s3494_s14, 4  }
 0x831   : > { %s4793_s27 = sld [smem:[#allocation8_spill]]  ;;  %s4794_s25 = smov %s3386_s26 }
 0x832   : > { %s4796_s28 = smov %s3494_s14  ;;  %25 = sbr.rel (!%p23_p2) target bundleno = 6 (0x6), region = 120 }
 0x836   : > { %s4795_s26 = smov %s4792_s1 }
 0x837   :  { %2679 = vsyncpa [#allocation5], 1 }
 0x838   :  { %2681 = vsyncpa [#allocation5 + $0x1], 1 }

</bundles_post_ra>
